<compile_context>
chip_gen: v7x
topology: tpu7x:2x2x1
jax: 0.10.0
libtpu: 0.0.40
codegen_flags: <defaults>
</compile_context>

<pallas_src>
import jax
import jax.numpy as jnp
from jax.experimental import pallas as pl
from jax.experimental.pallas import tpu as pltpu

# ----- small synthetic RoBERTa config (lane-dense: multiples of 128 on the feature axis) -----
BATCH = 2
SEQ = 8
HIDDEN = 128
INTERMEDIATE = 256
N_LAYERS = 2
VOCAB = 100
MAX_POS = 64
LN_EPS = 1e-5
INIT_RANGE = 0.02              # config.initializer_range
SCALE = 1.0 / (HIDDEN ** 0.5)  # single head, head_dim == HIDDEN
F32 = jnp.float32
BF16 = jnp.bfloat16

# Sequences processed per grid step.  BATCH => single grid step (best on single-TC v5e/v6e).
# Set to 1 on v7x so each of the two TensorCores takes one sequence.
SEQS_PER_STEP = BATCH


# -------------------- in-kernel helpers --------------------
def _layernorm(x, gamma, beta, eps=LN_EPS):
    # Fused reduction form: sum and sum-of-squares issued back-to-back (pipelines the XLU).
    mu = jnp.mean(x, axis=-1, keepdims=True)
    ms = jnp.mean(x * x, axis=-1, keepdims=True)
    var = ms - mu * mu
    return (x - mu) * jax.lax.rsqrt(var + eps) * gamma + beta


# -------------------- the single fused kernel --------------------
def fused_roberta_kernel(
    emb_ref, bias_ref,              # per-step activation blocks
    small_g_ref,                    # [8, H]  packed global small params (f32)
    small_l_ref,                    # [L, 9, H] packed per-layer small params (f32)
    b1_ref,                         # [L, 1, I] FFN-1 bias (f32)
    wqkv_ref,                       # [L, H, 3H] bf16 (scale folded into Q columns)
    wo_ref,                         # [L, H, H]  bf16
    w1_ref,                         # [L, H, I]  bf16
    w2_ref,                         # [L, I, H]  bf16
    head_w_ref,                     # [3, H, H]  bf16 (pooler, reg linear1, reg linear2 padded)
    out_ref,                        # [bb, 1, H] lane-dense output block
):
    bb, S, H = emb_ref.shape
    rows = bb * S

    sg = small_g_ref[...]                                   # [8, H]
    emb_ln_g, emb_ln_b = sg[0], sg[1]
    pool_b = sg[2]
    reg_ln_g, reg_ln_b = sg[3], sg[4]
    reg_b1, reg_b2 = sg[5], sg[6]

    # embedding LayerNorm; batch folded into the sublane rows for every projection
    x = _layernorm(emb_ref[...].reshape(rows, H), emb_ln_g, emb_ln_b)   # [rows, H] f32
    mask_bias = bias_ref[...]                                           # [bb, 1, S] f32

    for l in range(N_LAYERS):                               # static unroll (N_LAYERS tiny)
        sl = small_l_ref[l]                                 # [9, H] f32
        bq, bk, bv, bo_ = sl[0], sl[1], sl[2], sl[3]
        ln1_g, ln1_b = sl[4], sl[5]
        b2, ln2_g, ln2_b = sl[6], sl[7], sl[8]
        b1 = b1_ref[l]                                      # [1, I]

        # --- single-head self-attention: fused QKV, residual + LayerNorm ---
        qkv = jnp.dot(x.astype(BF16), wqkv_ref[l],
                      preferred_element_type=jnp.float32)   # [rows, 3H] f32 accumulate
        q = (qkv[:, :H] + bq).reshape(bb, S, H)             # 1/sqrt(H) pre-folded at pack time
        k = (qkv[:, H:2 * H] + bk).reshape(bb, S, H)
        v = (qkv[:, 2 * H:] + bv).reshape(bb, S, H)

        # TODO(synk): at realistic S, verify (pl.lower_as_mlir) no VMEM transpose of k is
        #             materialized; keep K pre-transposed or go flash-style if it is.
        scores = jnp.einsum('bqd,bkd->bqk', q, k,
                            preferred_element_type=jnp.float32) + mask_bias   # [bb, S, S]
        m = jnp.max(scores, axis=-1, keepdims=True)
        e = jnp.exp(scores - m)                                                # EUP
        probs = e * pl.reciprocal(jnp.sum(e, axis=-1, keepdims=True), approx=True)
        ctx = jnp.einsum('bqk,bkd->bqd', probs, v,
                         preferred_element_type=jnp.float32).reshape(rows, H)
        attn = jnp.dot(ctx.astype(BF16), wo_ref[l],
                       preferred_element_type=jnp.float32) + bo_
        x = _layernorm(attn + x, ln1_g, ln1_b)

        # --- FFN (GELU), residual + LayerNorm ---
        h = jnp.dot(x.astype(BF16), w1_ref[l], preferred_element_type=jnp.float32) + b1
        # TODO(synk): HF roberta-base uses the exact erf GELU; tanh approximation used here.
        h = jax.nn.gelu(h, approximate=True)
        y = jnp.dot(h.astype(BF16), w2_ref[l], preferred_element_type=jnp.float32) + b2
        x = _layernorm(y + x, ln2_g, ln2_b)

    # --- pooler_output: tanh(Linear(CLS token)) for every sequence in the block ---
    cls = x.reshape(bb, S, H)[:, 0, :]                                          # [bb, H]
    pooled = jnp.tanh(jnp.dot(cls.astype(BF16), head_w_ref[0],
                              preferred_element_type=jnp.float32) + pool_b)

    # --- regression head: LayerNorm -> (Dropout=id) -> Linear -> (Dropout=id) -> Linear ---
    r = _layernorm(pooled, reg_ln_g, reg_ln_b)
    r = jnp.dot(r.astype(BF16), head_w_ref[1], preferred_element_type=jnp.float32) + reg_b1
    r = jnp.dot(r.astype(BF16), head_w_ref[2], preferred_element_type=jnp.float32) + reg_b2
    # [bb, H] with column 0 holding the real value; lane-dense, unmasked store
    out_ref[...] = r.reshape(bb, 1, H)


# -------------------- parameter init (PyTorch nn.Linear layout, deterministic) --------------------
def init_params(key):
    keys = iter(jax.random.split(key, 64))

    def nrm(shape):
        return INIT_RANGE * jax.random.normal(next(keys), shape, F32)

    zeros = lambda s: jnp.zeros(s, F32)
    ones = lambda s: jnp.ones(s, F32)

    params = {
        'word_emb': nrm((VOCAB, HIDDEN)),
        'pos_emb': nrm((MAX_POS, HIDDEN)),
        'type_emb': nrm((2, HIDDEN)),
        'emb_ln_g': ones((1, HIDDEN)), 'emb_ln_b': zeros((1, HIDDEN)),
        'layers': [],
        'pool_w': nrm((HIDDEN, HIDDEN)), 'pool_b': zeros((1, HIDDEN)),
        # regression head (LayerNorm weight=1 bias=0, Linear weight~N(0, init_range), bias=0)
        'reg_ln_g': ones((1, HIDDEN)), 'reg_ln_b': zeros((1, HIDDEN)),
        'reg_w1': nrm((HIDDEN, HIDDEN)), 'reg_b1': zeros((1, HIDDEN)),
        'reg_w2': nrm((1, HIDDEN)), 'reg_b2': zeros((1, 1)),
    }
    for _ in range(N_LAYERS):
        params['layers'].append({
            'wq': nrm((HIDDEN, HIDDEN)), 'bq': zeros((1, HIDDEN)),
            'wk': nrm((HIDDEN, HIDDEN)), 'bk': zeros((1, HIDDEN)),
            'wv': nrm((HIDDEN, HIDDEN)), 'bv': zeros((1, HIDDEN)),
            'wo': nrm((HIDDEN, HIDDEN)), 'bo': zeros((1, HIDDEN)),
            'attn_ln_g': ones((1, HIDDEN)), 'attn_ln_b': zeros((1, HIDDEN)),
            'w1': nrm((INTERMEDIATE, HIDDEN)), 'b1': zeros((1, INTERMEDIATE)),
            'w2': nrm((HIDDEN, INTERMEDIATE)), 'b2': zeros((1, HIDDEN)),
            'ffn_ln_g': ones((1, HIDDEN)), 'ffn_ln_b': zeros((1, HIDDEN)),
        })
    return params


def pack_params(p):
    """One-time wrapper-side repack:
       * transpose nn.Linear weights [out,in] -> [in,out]; fuse Q/K/V into [H,3H]
       * fold 1/sqrt(H) attention scale into the Q columns (weight and bias)
       * cast all matmul weights to bf16 (f32 accumulation kept in-kernel)
       * stack per-layer weights on a leading layer axis
       * pack the ~16 tiny [1,128] bias / LayerNorm params into two stacked f32 arrays
       * pad the 1-wide regression output column to a lane-dense 128-wide weight."""
    t = jnp.transpose
    layers = p['layers']
    stack = lambda f: jnp.stack([f(l) for l in layers], axis=0)

    def qkv_w(l):
        return jnp.concatenate([t(l['wq']) * SCALE, t(l['wk']), t(l['wv'])], axis=1)

    # per-layer small params, rows: bq(scaled), bk, bv, bo, ln1_g, ln1_b, b2, ln2_g, ln2_b
    small_l = jnp.stack([
        jnp.concatenate([
            l['bq'] * SCALE, l['bk'], l['bv'], l['bo'],
            l['attn_ln_g'], l['attn_ln_b'],
            l['b2'], l['ffn_ln_g'], l['ffn_ln_b'],
        ], axis=0)
        for l in layers], axis=0)                                  # [L, 9, H]

    # global small params, rows: emb_ln_g, emb_ln_b, pool_b, reg_ln_g, reg_ln_b, reg_b1,
    #                            reg_b2(padded), pad
    small_g = jnp.concatenate([
        p['emb_ln_g'], p['emb_ln_b'], p['pool_b'],
        p['reg_ln_g'], p['reg_ln_b'], p['reg_b1'],
        jnp.pad(p['reg_b2'], ((0, 0), (0, HIDDEN - 1))),
        jnp.zeros((1, HIDDEN), F32),
    ], axis=0)                                                     # [8, H]

    head_w = jnp.stack([
        t(p['pool_w']),
        t(p['reg_w1']),
        jnp.pad(t(p['reg_w2']), ((0, 0), (0, HIDDEN - 1))),        # [H,1] -> [H,128]
    ], axis=0)                                                     # [3, H, H]

    return {
        'word_emb': p['word_emb'], 'pos_emb': p['pos_emb'], 'type_emb': p['type_emb'],
        'small_g': small_g,
        'small_l': small_l,
        'b1s': stack(lambda l: l['b1']),                           # [L, 1, I] f32
        'wqkv': stack(qkv_w).astype(BF16),                         # [L, H, 3H]
        'wo': stack(lambda l: t(l['wo'])).astype(BF16),            # [L, H, H]
        'w1': stack(lambda l: t(l['w1'])).astype(BF16),            # [L, H, I]
        'w2': stack(lambda l: t(l['w2'])).astype(BF16),            # [L, I, H]
        'head_w': head_w.astype(BF16),                             # [3, H, H]
    }


# -------------------- model forward (one fused pallas_call) --------------------
_WEIGHT_ORDER = ('small_g', 'small_l', 'b1s', 'wqkv', 'wo', 'w1', 'w2', 'head_w')


def commonlit_roberta_forward(packed, input_ids, attention_mask):
    B, S, H = input_ids.shape[0], input_ids.shape[1], HIDDEN
    bb = SEQS_PER_STEP
    n_steps = B // bb

    # ----- embeddings (gathers are glue in plain JAX at this scale) -----
    we = packed['word_emb'][input_ids]                       # [B, S, H]
    pe = packed['pos_emb'][jnp.arange(S)][None]              # [1, S, H]
    te = packed['type_emb'][0][None, None]                   # [1, 1, H]
    emb = (we + pe + te).astype(F32)

    # additive attention-mask bias, computed once here (not per layer in the kernel)
    bias = (1.0 - attention_mask.astype(F32))[:, None, :] * jnp.float32(-1e9)   # [B, 1, S]

    def full_spec(arr):
        # whole-array VMEM block, same block every grid step (weights stay resident)
        return pl.BlockSpec(arr.shape, lambda i, n=arr.ndim: (0,) * n)

    weights = [packed[k] for k in _WEIGHT_ORDER]

    out = pl.pallas_call(
        fused_roberta_kernel,
        out_shape=jax.ShapeDtypeStruct((B, 1, H), F32),
        grid=(n_steps,),
        in_specs=[pl.BlockSpec((bb, S, H), lambda i: (i, 0, 0)),   # embeddings
                  pl.BlockSpec((bb, 1, S), lambda i: (i, 0, 0))]   # mask bias
                 + [full_spec(w) for w in weights],
        out_specs=pl.BlockSpec((bb, 1, H), lambda i: (i, 0, 0)),
        compiler_params=pltpu.CompilerParams(
            dimension_semantics=(("parallel",) if n_steps > 1 else ("arbitrary",)),
            vmem_limit_bytes=32 * 1024 * 1024),
    )(emb, bias, *weights)

    # lane-dense padded output -> the real [B, 1] regression output
    return out[:, 0, :1]


# NOTE: self.att_head (AttentionHead) is constructed in __init__ but never used in forward.


if __name__ == "__main__":
    key = jax.random.PRNGKey(0)
    pkey, ikey = jax.random.split(key)
    params = init_params(pkey)
    packed = pack_params(params)   # one-time repack: transpose, fuse QKV, bf16, pack smalls

    input_ids = jax.random.randint(ikey, (BATCH, SEQ), 0, VOCAB, dtype=jnp.int32)
    attention_mask = jnp.ones((BATCH, SEQ), dtype=jnp.int32).at[1, SEQ - 2:].set(0)

    out = jax.jit(commonlit_roberta_forward)(packed, input_ids, attention_mask)
    out = jax.block_until_ready(out)
    assert out.shape == (BATCH, 1) and out.dtype == jnp.float32
    print("KERNEL_OK")
</pallas_src>

<mosaic_0001>
module attributes {stable_mosaic.version = 11 : i64} {
  func.func @fused_roberta_kernel(%arg0: i32, %arg1: memref<2x8x128xf32, #tpu.memory_space<vmem>>, %arg2: memref<2x1x8xf32, #tpu.memory_space<vmem>>, %arg3: memref<8x128xf32, #tpu.memory_space<vmem>>, %arg4: memref<2x9x128xf32, #tpu.memory_space<vmem>>, %arg5: memref<2x1x256xf32, #tpu.memory_space<vmem>>, %arg6: memref<2x128x384xbf16, #tpu.memory_space<vmem>>, %arg7: memref<2x128x128xbf16, #tpu.memory_space<vmem>>, %arg8: memref<2x128x256xbf16, #tpu.memory_space<vmem>>, %arg9: memref<2x256x128xbf16, #tpu.memory_space<vmem>>, %arg10: memref<3x128x128xbf16, #tpu.memory_space<vmem>>, %arg11: memref<2x1x128xf32, #tpu.memory_space<vmem>>) attributes {dimension_semantics = [#tpu.dimension_semantics<arbitrary>], iteration_bounds = array<i64: 1>, scalar_prefetch = 0 : i64, scratch_operands = 0 : i64, tpu.core_type = #tpu.core_type<tc>, window_params = [{transform_indices = @transform_0, window_bounds = array<i64: 2, 8, 128>}, {transform_indices = @transform_1, window_bounds = array<i64: 2, 1, 8>}, {pipeline_mode = #tpu.pipeline_mode<synchronous>, transform_indices = @transform_2, window_bounds = array<i64: 8, 128>}, {pipeline_mode = #tpu.pipeline_mode<synchronous>, transform_indices = @transform_3, window_bounds = array<i64: 2, 9, 128>}, {pipeline_mode = #tpu.pipeline_mode<synchronous>, transform_indices = @transform_4, window_bounds = array<i64: 2, 1, 256>}, {pipeline_mode = #tpu.pipeline_mode<synchronous>, transform_indices = @transform_5, window_bounds = array<i64: 2, 128, 384>}, {pipeline_mode = #tpu.pipeline_mode<synchronous>, transform_indices = @transform_6, window_bounds = array<i64: 2, 128, 128>}, {pipeline_mode = #tpu.pipeline_mode<synchronous>, transform_indices = @transform_7, window_bounds = array<i64: 2, 128, 256>}, {pipeline_mode = #tpu.pipeline_mode<synchronous>, transform_indices = @transform_8, window_bounds = array<i64: 2, 256, 128>}, {pipeline_mode = #tpu.pipeline_mode<synchronous>, transform_indices = @transform_9, window_bounds = array<i64: 3, 128, 128>}, {transform_indices = @transform_10, window_bounds = array<i64: 2, 1, 128>}]} {
    %c0 = arith.constant 0 : index
    %c0_0 = arith.constant 0 : index
    %0 = vector.load %arg3[%c0, %c0_0] : memref<8x128xf32, #tpu.memory_space<vmem>>, vector<8x128xf32>
    %1 = vector.extract_strided_slice %0 {offsets = [0, 0], sizes = [1, 128], strides = [1, 1]} : vector<8x128xf32> to vector<1x128xf32>
    %2 = vector.shape_cast %1 : vector<1x128xf32> to vector<128xf32>
    %3 = vector.extract_strided_slice %0 {offsets = [1, 0], sizes = [1, 128], strides = [1, 1]} : vector<8x128xf32> to vector<1x128xf32>
    %4 = vector.shape_cast %3 : vector<1x128xf32> to vector<128xf32>
    %5 = vector.extract_strided_slice %0 {offsets = [2, 0], sizes = [1, 128], strides = [1, 1]} : vector<8x128xf32> to vector<1x128xf32>
    %6 = vector.shape_cast %5 : vector<1x128xf32> to vector<128xf32>
    %7 = vector.extract_strided_slice %0 {offsets = [3, 0], sizes = [1, 128], strides = [1, 1]} : vector<8x128xf32> to vector<1x128xf32>
    %8 = vector.shape_cast %7 : vector<1x128xf32> to vector<128xf32>
    %9 = vector.extract_strided_slice %0 {offsets = [4, 0], sizes = [1, 128], strides = [1, 1]} : vector<8x128xf32> to vector<1x128xf32>
    %10 = vector.shape_cast %9 : vector<1x128xf32> to vector<128xf32>
    %11 = vector.extract_strided_slice %0 {offsets = [5, 0], sizes = [1, 128], strides = [1, 1]} : vector<8x128xf32> to vector<1x128xf32>
    %12 = vector.shape_cast %11 : vector<1x128xf32> to vector<128xf32>
    %13 = vector.extract_strided_slice %0 {offsets = [6, 0], sizes = [1, 128], strides = [1, 1]} : vector<8x128xf32> to vector<1x128xf32>
    %14 = vector.shape_cast %13 : vector<1x128xf32> to vector<128xf32>
    %c0_1 = arith.constant 0 : index
    %c0_2 = arith.constant 0 : index
    %c0_3 = arith.constant 0 : index
    %15 = vector.load %arg1[%c0_1, %c0_2, %c0_3] : memref<2x8x128xf32, #tpu.memory_space<vmem>>, vector<2x8x128xf32>
    %16 = vector.shape_cast %15 : vector<2x8x128xf32> to vector<16x128xf32>
    %cst = arith.constant dense<0.000000e+00> : vector<16xf32>
    %17 = vector.multi_reduction <add>, %16, %cst [1] : vector<16x128xf32> to vector<16xf32>
    %18 = vector.shape_cast %17 : vector<16xf32> to vector<16x1xf32>
    %cst_4 = arith.constant 1.280000e+02 : f32
    %19 = vector.broadcast %cst_4 : f32 to vector<16x1xf32>
    %20 = arith.divf %18, %19 : vector<16x1xf32>
    %21 = arith.mulf %16, %16 : vector<16x128xf32>
    %cst_5 = arith.constant dense<0.000000e+00> : vector<16xf32>
    %22 = vector.multi_reduction <add>, %21, %cst_5 [1] : vector<16x128xf32> to vector<16xf32>
    %23 = vector.shape_cast %22 : vector<16xf32> to vector<16x1xf32>
    %cst_6 = arith.constant 1.280000e+02 : f32
    %24 = vector.broadcast %cst_6 : f32 to vector<16x1xf32>
    %25 = arith.divf %23, %24 : vector<16x1xf32>
    %26 = arith.mulf %20, %20 : vector<16x1xf32>
    %27 = arith.subf %25, %26 : vector<16x1xf32>
    %28 = vector.broadcast %20 : vector<16x1xf32> to vector<16x128xf32>
    %29 = arith.subf %16, %28 : vector<16x128xf32>
    %cst_7 = arith.constant 9.99999974E-6 : f32
    %30 = vector.broadcast %cst_7 : f32 to vector<16x1xf32>
    %31 = arith.addf %27, %30 : vector<16x1xf32>
    %32 = math.rsqrt %31 : vector<16x1xf32>
    %33 = vector.broadcast %32 : vector<16x1xf32> to vector<16x128xf32>
    %34 = arith.mulf %29, %33 : vector<16x128xf32>
    %35 = vector.shape_cast %2 : vector<128xf32> to vector<1x128xf32>
    %36 = vector.broadcast %35 : vector<1x128xf32> to vector<16x128xf32>
    %37 = arith.mulf %34, %36 : vector<16x128xf32>
    %38 = vector.shape_cast %4 : vector<128xf32> to vector<1x128xf32>
    %39 = vector.broadcast %38 : vector<1x128xf32> to vector<16x128xf32>
    %40 = arith.addf %37, %39 : vector<16x128xf32>
    %c0_8 = arith.constant 0 : index
    %c0_9 = arith.constant 0 : index
    %c0_10 = arith.constant 0 : index
    %41 = vector.load %arg2[%c0_8, %c0_9, %c0_10] : memref<2x1x8xf32, #tpu.memory_space<vmem>>, vector<2x1x8xf32>
    %c0_11 = arith.constant 0 : index
    %c0_12 = arith.constant 0 : index
    %c0_13 = arith.constant 0 : index
    %42 = vector.load %arg4[%c0_11, %c0_12, %c0_13] : memref<2x9x128xf32, #tpu.memory_space<vmem>>, vector<1x9x128xf32>
    %43 = vector.shape_cast %42 : vector<1x9x128xf32> to vector<9x128xf32>
    %44 = vector.extract_strided_slice %43 {offsets = [0, 0], sizes = [1, 128], strides = [1, 1]} : vector<9x128xf32> to vector<1x128xf32>
    %45 = vector.shape_cast %44 : vector<1x128xf32> to vector<128xf32>
    %46 = vector.extract_strided_slice %43 {offsets = [1, 0], sizes = [1, 128], strides = [1, 1]} : vector<9x128xf32> to vector<1x128xf32>
    %47 = vector.shape_cast %46 : vector<1x128xf32> to vector<128xf32>
    %48 = vector.extract_strided_slice %43 {offsets = [2, 0], sizes = [1, 128], strides = [1, 1]} : vector<9x128xf32> to vector<1x128xf32>
    %49 = vector.shape_cast %48 : vector<1x128xf32> to vector<128xf32>
    %50 = vector.extract_strided_slice %43 {offsets = [3, 0], sizes = [1, 128], strides = [1, 1]} : vector<9x128xf32> to vector<1x128xf32>
    %51 = vector.shape_cast %50 : vector<1x128xf32> to vector<128xf32>
    %52 = vector.extract_strided_slice %43 {offsets = [4, 0], sizes = [1, 128], strides = [1, 1]} : vector<9x128xf32> to vector<1x128xf32>
    %53 = vector.shape_cast %52 : vector<1x128xf32> to vector<128xf32>
    %54 = vector.extract_strided_slice %43 {offsets = [5, 0], sizes = [1, 128], strides = [1, 1]} : vector<9x128xf32> to vector<1x128xf32>
    %55 = vector.shape_cast %54 : vector<1x128xf32> to vector<128xf32>
    %56 = vector.extract_strided_slice %43 {offsets = [6, 0], sizes = [1, 128], strides = [1, 1]} : vector<9x128xf32> to vector<1x128xf32>
    %57 = vector.shape_cast %56 : vector<1x128xf32> to vector<128xf32>
    %58 = vector.extract_strided_slice %43 {offsets = [7, 0], sizes = [1, 128], strides = [1, 1]} : vector<9x128xf32> to vector<1x128xf32>
    %59 = vector.shape_cast %58 : vector<1x128xf32> to vector<128xf32>
    %60 = vector.extract_strided_slice %43 {offsets = [8, 0], sizes = [1, 128], strides = [1, 1]} : vector<9x128xf32> to vector<1x128xf32>
    %61 = vector.shape_cast %60 : vector<1x128xf32> to vector<128xf32>
    %c0_14 = arith.constant 0 : index
    %c0_15 = arith.constant 0 : index
    %c0_16 = arith.constant 0 : index
    %62 = vector.load %arg5[%c0_14, %c0_15, %c0_16] : memref<2x1x256xf32, #tpu.memory_space<vmem>>, vector<1x1x256xf32>
    %63 = vector.shape_cast %62 : vector<1x1x256xf32> to vector<1x256xf32>
    %64 = arith.truncf %40 : vector<16x128xf32> to vector<16x128xbf16>
    %c0_17 = arith.constant 0 : index
    %c0_18 = arith.constant 0 : index
    %c0_19 = arith.constant 0 : index
    %65 = vector.load %arg6[%c0_17, %c0_18, %c0_19] : memref<2x128x384xbf16, #tpu.memory_space<vmem>>, vector<1x128x384xbf16>
    %66 = vector.shape_cast %65 : vector<1x128x384xbf16> to vector<128x384xbf16>
    %cst_20 = arith.constant dense<0.000000e+00> : vector<16x384xf32>
    %67 = tpu.matmul %64, %66, %cst_20 {dimension_numbers = #tpu.dot_dimension_numbers<[1], [0], [0], [1], [0, 0, 1, 1], [], []>} : vector<16x128xbf16>, vector<128x384xbf16>, vector<16x384xf32> -> vector<16x384xf32>
    %68 = vector.extract_strided_slice %67 {offsets = [0, 0], sizes = [16, 128], strides = [1, 1]} : vector<16x384xf32> to vector<16x128xf32>
    %69 = vector.shape_cast %45 : vector<128xf32> to vector<1x128xf32>
    %70 = vector.broadcast %69 : vector<1x128xf32> to vector<16x128xf32>
    %71 = arith.addf %68, %70 : vector<16x128xf32>
    %72 = vector.shape_cast %71 : vector<16x128xf32> to vector<2x8x128xf32>
    %73 = vector.extract_strided_slice %67 {offsets = [0, 128], sizes = [16, 128], strides = [1, 1]} : vector<16x384xf32> to vector<16x128xf32>
    %74 = vector.shape_cast %47 : vector<128xf32> to vector<1x128xf32>
    %75 = vector.broadcast %74 : vector<1x128xf32> to vector<16x128xf32>
    %76 = arith.addf %73, %75 : vector<16x128xf32>
    %77 = vector.shape_cast %76 : vector<16x128xf32> to vector<2x8x128xf32>
    %78 = vector.extract_strided_slice %67 {offsets = [0, 256], sizes = [16, 128], strides = [1, 1]} : vector<16x384xf32> to vector<16x128xf32>
    %79 = vector.shape_cast %49 : vector<128xf32> to vector<1x128xf32>
    %80 = vector.broadcast %79 : vector<1x128xf32> to vector<16x128xf32>
    %81 = arith.addf %78, %80 : vector<16x128xf32>
    %82 = vector.shape_cast %81 : vector<16x128xf32> to vector<2x8x128xf32>
    "tpu.trace_start"() <{level = 10 : i32, message = "bqd,bkd->bqk"}> : () -> ()
    %cst_21 = arith.constant dense<0.000000e+00> : vector<2x8x8xf32>
    %83 = tpu.matmul %72, %77, %cst_21 {dimension_numbers = #tpu.dot_dimension_numbers<[2], [2], [1], [1], [0, 0, 0, 1, 1, 1], [0], [0]>} : vector<2x8x128xf32>, vector<2x8x128xf32>, vector<2x8x8xf32> -> vector<2x8x8xf32>
    "tpu.trace_stop"() : () -> ()
    %84 = vector.broadcast %41 : vector<2x1x8xf32> to vector<2x8x8xf32>
    %85 = arith.addf %83, %84 : vector<2x8x8xf32>
    %cst_22 = arith.constant dense<0xFF800000> : vector<2x8xf32>
    %86 = vector.multi_reduction <maximumf>, %85, %cst_22 [2] : vector<2x8x8xf32> to vector<2x8xf32>
    %87 = vector.shape_cast %86 : vector<2x8xf32> to vector<2x8x1xf32>
    %88 = vector.broadcast %87 : vector<2x8x1xf32> to vector<2x8x8xf32>
    %89 = arith.subf %85, %88 : vector<2x8x8xf32>
    %90 = math.exp %89 : vector<2x8x8xf32>
    %cst_23 = arith.constant dense<0.000000e+00> : vector<2x8xf32>
    %91 = vector.multi_reduction <add>, %90, %cst_23 [2] : vector<2x8x8xf32> to vector<2x8xf32>
    %92 = vector.shape_cast %91 : vector<2x8xf32> to vector<2x8x1xf32>
    %93 = tpu.reciprocal %92 {approx = true} : vector<2x8x1xf32> -> vector<2x8x1xf32>
    %94 = vector.broadcast %93 : vector<2x8x1xf32> to vector<2x8x8xf32>
    %95 = arith.mulf %90, %94 : vector<2x8x8xf32>
    "tpu.trace_start"() <{level = 10 : i32, message = "bqk,bkd->bqd"}> : () -> ()
    %cst_24 = arith.constant dense<0.000000e+00> : vector<2x8x128xf32>
    %96 = tpu.matmul %95, %82, %cst_24 {dimension_numbers = #tpu.dot_dimension_numbers<[2], [1], [1], [2], [0, 0, 0, 1, 1, 2], [0], [0]>} : vector<2x8x8xf32>, vector<2x8x128xf32>, vector<2x8x128xf32> -> vector<2x8x128xf32>
    "tpu.trace_stop"() : () -> ()
    %97 = vector.shape_cast %96 : vector<2x8x128xf32> to vector<16x128xf32>
    %98 = arith.truncf %97 : vector<16x128xf32> to vector<16x128xbf16>
    %c0_25 = arith.constant 0 : index
    %c0_26 = arith.constant 0 : index
    %c0_27 = arith.constant 0 : index
    %99 = vector.load %arg7[%c0_25, %c0_26, %c0_27] : memref<2x128x128xbf16, #tpu.memory_space<vmem>>, vector<1x128x128xbf16>
    %100 = vector.shape_cast %99 : vector<1x128x128xbf16> to vector<128x128xbf16>
    %cst_28 = arith.constant dense<0.000000e+00> : vector<16x128xf32>
    %101 = tpu.matmul %98, %100, %cst_28 {dimension_numbers = #tpu.dot_dimension_numbers<[1], [0], [0], [1], [0, 0, 1, 1], [], []>} : vector<16x128xbf16>, vector<128x128xbf16>, vector<16x128xf32> -> vector<16x128xf32>
    %102 = vector.shape_cast %51 : vector<128xf32> to vector<1x128xf32>
    %103 = vector.broadcast %102 : vector<1x128xf32> to vector<16x128xf32>
    %104 = arith.addf %101, %103 : vector<16x128xf32>
    %105 = arith.addf %104, %40 : vector<16x128xf32>
    %cst_29 = arith.constant dense<0.000000e+00> : vector<16xf32>
    %106 = vector.multi_reduction <add>, %105, %cst_29 [1] : vector<16x128xf32> to vector<16xf32>
    %107 = vector.shape_cast %106 : vector<16xf32> to vector<16x1xf32>
    %cst_30 = arith.constant 1.280000e+02 : f32
    %108 = vector.broadcast %cst_30 : f32 to vector<16x1xf32>
    %109 = arith.divf %107, %108 : vector<16x1xf32>
    %110 = arith.mulf %105, %105 : vector<16x128xf32>
    %cst_31 = arith.constant dense<0.000000e+00> : vector<16xf32>
    %111 = vector.multi_reduction <add>, %110, %cst_31 [1] : vector<16x128xf32> to vector<16xf32>
    %112 = vector.shape_cast %111 : vector<16xf32> to vector<16x1xf32>
    %cst_32 = arith.constant 1.280000e+02 : f32
    %113 = vector.broadcast %cst_32 : f32 to vector<16x1xf32>
    %114 = arith.divf %112, %113 : vector<16x1xf32>
    %115 = arith.mulf %109, %109 : vector<16x1xf32>
    %116 = arith.subf %114, %115 : vector<16x1xf32>
    %117 = vector.broadcast %109 : vector<16x1xf32> to vector<16x128xf32>
    %118 = arith.subf %105, %117 : vector<16x128xf32>
    %cst_33 = arith.constant 9.99999974E-6 : f32
    %119 = vector.broadcast %cst_33 : f32 to vector<16x1xf32>
    %120 = arith.addf %116, %119 : vector<16x1xf32>
    %121 = math.rsqrt %120 : vector<16x1xf32>
    %122 = vector.broadcast %121 : vector<16x1xf32> to vector<16x128xf32>
    %123 = arith.mulf %118, %122 : vector<16x128xf32>
    %124 = vector.shape_cast %53 : vector<128xf32> to vector<1x128xf32>
    %125 = vector.broadcast %124 : vector<1x128xf32> to vector<16x128xf32>
    %126 = arith.mulf %123, %125 : vector<16x128xf32>
    %127 = vector.shape_cast %55 : vector<128xf32> to vector<1x128xf32>
    %128 = vector.broadcast %127 : vector<1x128xf32> to vector<16x128xf32>
    %129 = arith.addf %126, %128 : vector<16x128xf32>
    %130 = arith.truncf %129 : vector<16x128xf32> to vector<16x128xbf16>
    %c0_34 = arith.constant 0 : index
    %c0_35 = arith.constant 0 : index
    %c0_36 = arith.constant 0 : index
    %131 = vector.load %arg8[%c0_34, %c0_35, %c0_36] : memref<2x128x256xbf16, #tpu.memory_space<vmem>>, vector<1x128x256xbf16>
    %132 = vector.shape_cast %131 : vector<1x128x256xbf16> to vector<128x256xbf16>
    %cst_37 = arith.constant dense<0.000000e+00> : vector<16x256xf32>
    %133 = tpu.matmul %130, %132, %cst_37 {dimension_numbers = #tpu.dot_dimension_numbers<[1], [0], [0], [1], [0, 0, 1, 1], [], []>} : vector<16x128xbf16>, vector<128x256xbf16>, vector<16x256xf32> -> vector<16x256xf32>
    %134 = vector.broadcast %63 : vector<1x256xf32> to vector<16x256xf32>
    %135 = arith.addf %133, %134 : vector<16x256xf32>
    %136 = arith.mulf %135, %135 : vector<16x256xf32>
    %137 = arith.mulf %135, %136 : vector<16x256xf32>
    %cst_38 = arith.constant 4.471500e-02 : f32
    %138 = vector.broadcast %cst_38 : f32 to vector<16x256xf32>
    %139 = arith.mulf %138, %137 : vector<16x256xf32>
    %140 = arith.addf %135, %139 : vector<16x256xf32>
    %cst_39 = arith.constant 0.797884583 : f32
    %141 = vector.broadcast %cst_39 : f32 to vector<16x256xf32>
    %142 = arith.mulf %141, %140 : vector<16x256xf32>
    %143 = math.tanh %142 : vector<16x256xf32>
    %cst_40 = arith.constant 1.000000e+00 : f32
    %144 = vector.broadcast %cst_40 : f32 to vector<16x256xf32>
    %145 = arith.addf %144, %143 : vector<16x256xf32>
    %cst_41 = arith.constant 5.000000e-01 : f32
    %146 = vector.broadcast %cst_41 : f32 to vector<16x256xf32>
    %147 = arith.mulf %146, %145 : vector<16x256xf32>
    %148 = arith.mulf %135, %147 : vector<16x256xf32>
    %149 = arith.truncf %148 : vector<16x256xf32> to vector<16x256xbf16>
    %c0_42 = arith.constant 0 : index
    %c0_43 = arith.constant 0 : index
    %c0_44 = arith.constant 0 : index
    %150 = vector.load %arg9[%c0_42, %c0_43, %c0_44] : memref<2x256x128xbf16, #tpu.memory_space<vmem>>, vector<1x256x128xbf16>
    %151 = vector.shape_cast %150 : vector<1x256x128xbf16> to vector<256x128xbf16>
    %cst_45 = arith.constant dense<0.000000e+00> : vector<16x128xf32>
    %152 = tpu.matmul %149, %151, %cst_45 {dimension_numbers = #tpu.dot_dimension_numbers<[1], [0], [0], [1], [0, 0, 1, 1], [], []>} : vector<16x256xbf16>, vector<256x128xbf16>, vector<16x128xf32> -> vector<16x128xf32>
    %153 = vector.shape_cast %57 : vector<128xf32> to vector<1x128xf32>
    %154 = vector.broadcast %153 : vector<1x128xf32> to vector<16x128xf32>
    %155 = arith.addf %152, %154 : vector<16x128xf32>
    %156 = arith.addf %155, %129 : vector<16x128xf32>
    %cst_46 = arith.constant dense<0.000000e+00> : vector<16xf32>
    %157 = vector.multi_reduction <add>, %156, %cst_46 [1] : vector<16x128xf32> to vector<16xf32>
    %158 = vector.shape_cast %157 : vector<16xf32> to vector<16x1xf32>
    %cst_47 = arith.constant 1.280000e+02 : f32
    %159 = vector.broadcast %cst_47 : f32 to vector<16x1xf32>
    %160 = arith.divf %158, %159 : vector<16x1xf32>
    %161 = arith.mulf %156, %156 : vector<16x128xf32>
    %cst_48 = arith.constant dense<0.000000e+00> : vector<16xf32>
    %162 = vector.multi_reduction <add>, %161, %cst_48 [1] : vector<16x128xf32> to vector<16xf32>
    %163 = vector.shape_cast %162 : vector<16xf32> to vector<16x1xf32>
    %cst_49 = arith.constant 1.280000e+02 : f32
    %164 = vector.broadcast %cst_49 : f32 to vector<16x1xf32>
    %165 = arith.divf %163, %164 : vector<16x1xf32>
    %166 = arith.mulf %160, %160 : vector<16x1xf32>
    %167 = arith.subf %165, %166 : vector<16x1xf32>
    %168 = vector.broadcast %160 : vector<16x1xf32> to vector<16x128xf32>
    %169 = arith.subf %156, %168 : vector<16x128xf32>
    %cst_50 = arith.constant 9.99999974E-6 : f32
    %170 = vector.broadcast %cst_50 : f32 to vector<16x1xf32>
    %171 = arith.addf %167, %170 : vector<16x1xf32>
    %172 = math.rsqrt %171 : vector<16x1xf32>
    %173 = vector.broadcast %172 : vector<16x1xf32> to vector<16x128xf32>
    %174 = arith.mulf %169, %173 : vector<16x128xf32>
    %175 = vector.shape_cast %59 : vector<128xf32> to vector<1x128xf32>
    %176 = vector.broadcast %175 : vector<1x128xf32> to vector<16x128xf32>
    %177 = arith.mulf %174, %176 : vector<16x128xf32>
    %178 = vector.shape_cast %61 : vector<128xf32> to vector<1x128xf32>
    %179 = vector.broadcast %178 : vector<1x128xf32> to vector<16x128xf32>
    %180 = arith.addf %177, %179 : vector<16x128xf32>
    %c1 = arith.constant 1 : index
    %c0_51 = arith.constant 0 : index
    %c0_52 = arith.constant 0 : index
    %181 = vector.load %arg4[%c1, %c0_51, %c0_52] : memref<2x9x128xf32, #tpu.memory_space<vmem>>, vector<1x9x128xf32>
    %182 = vector.shape_cast %181 : vector<1x9x128xf32> to vector<9x128xf32>
    %183 = vector.extract_strided_slice %182 {offsets = [0, 0], sizes = [1, 128], strides = [1, 1]} : vector<9x128xf32> to vector<1x128xf32>
    %184 = vector.shape_cast %183 : vector<1x128xf32> to vector<128xf32>
    %185 = vector.extract_strided_slice %182 {offsets = [1, 0], sizes = [1, 128], strides = [1, 1]} : vector<9x128xf32> to vector<1x128xf32>
    %186 = vector.shape_cast %185 : vector<1x128xf32> to vector<128xf32>
    %187 = vector.extract_strided_slice %182 {offsets = [2, 0], sizes = [1, 128], strides = [1, 1]} : vector<9x128xf32> to vector<1x128xf32>
    %188 = vector.shape_cast %187 : vector<1x128xf32> to vector<128xf32>
    %189 = vector.extract_strided_slice %182 {offsets = [3, 0], sizes = [1, 128], strides = [1, 1]} : vector<9x128xf32> to vector<1x128xf32>
    %190 = vector.shape_cast %189 : vector<1x128xf32> to vector<128xf32>
    %191 = vector.extract_strided_slice %182 {offsets = [4, 0], sizes = [1, 128], strides = [1, 1]} : vector<9x128xf32> to vector<1x128xf32>
    %192 = vector.shape_cast %191 : vector<1x128xf32> to vector<128xf32>
    %193 = vector.extract_strided_slice %182 {offsets = [5, 0], sizes = [1, 128], strides = [1, 1]} : vector<9x128xf32> to vector<1x128xf32>
    %194 = vector.shape_cast %193 : vector<1x128xf32> to vector<128xf32>
    %195 = vector.extract_strided_slice %182 {offsets = [6, 0], sizes = [1, 128], strides = [1, 1]} : vector<9x128xf32> to vector<1x128xf32>
    %196 = vector.shape_cast %195 : vector<1x128xf32> to vector<128xf32>
    %197 = vector.extract_strided_slice %182 {offsets = [7, 0], sizes = [1, 128], strides = [1, 1]} : vector<9x128xf32> to vector<1x128xf32>
    %198 = vector.shape_cast %197 : vector<1x128xf32> to vector<128xf32>
    %199 = vector.extract_strided_slice %182 {offsets = [8, 0], sizes = [1, 128], strides = [1, 1]} : vector<9x128xf32> to vector<1x128xf32>
    %200 = vector.shape_cast %199 : vector<1x128xf32> to vector<128xf32>
    %c1_53 = arith.constant 1 : index
    %c0_54 = arith.constant 0 : index
    %c0_55 = arith.constant 0 : index
    %201 = vector.load %arg5[%c1_53, %c0_54, %c0_55] : memref<2x1x256xf32, #tpu.memory_space<vmem>>, vector<1x1x256xf32>
    %202 = vector.shape_cast %201 : vector<1x1x256xf32> to vector<1x256xf32>
    %203 = arith.truncf %180 : vector<16x128xf32> to vector<16x128xbf16>
    %c1_56 = arith.constant 1 : index
    %c0_57 = arith.constant 0 : index
    %c0_58 = arith.constant 0 : index
    %204 = vector.load %arg6[%c1_56, %c0_57, %c0_58] : memref<2x128x384xbf16, #tpu.memory_space<vmem>>, vector<1x128x384xbf16>
    %205 = vector.shape_cast %204 : vector<1x128x384xbf16> to vector<128x384xbf16>
    %cst_59 = arith.constant dense<0.000000e+00> : vector<16x384xf32>
    %206 = tpu.matmul %203, %205, %cst_59 {dimension_numbers = #tpu.dot_dimension_numbers<[1], [0], [0], [1], [0, 0, 1, 1], [], []>} : vector<16x128xbf16>, vector<128x384xbf16>, vector<16x384xf32> -> vector<16x384xf32>
    %207 = vector.extract_strided_slice %206 {offsets = [0, 0], sizes = [16, 128], strides = [1, 1]} : vector<16x384xf32> to vector<16x128xf32>
    %208 = vector.shape_cast %184 : vector<128xf32> to vector<1x128xf32>
    %209 = vector.broadcast %208 : vector<1x128xf32> to vector<16x128xf32>
    %210 = arith.addf %207, %209 : vector<16x128xf32>
    %211 = vector.shape_cast %210 : vector<16x128xf32> to vector<2x8x128xf32>
    %212 = vector.extract_strided_slice %206 {offsets = [0, 128], sizes = [16, 128], strides = [1, 1]} : vector<16x384xf32> to vector<16x128xf32>
    %213 = vector.shape_cast %186 : vector<128xf32> to vector<1x128xf32>
    %214 = vector.broadcast %213 : vector<1x128xf32> to vector<16x128xf32>
    %215 = arith.addf %212, %214 : vector<16x128xf32>
    %216 = vector.shape_cast %215 : vector<16x128xf32> to vector<2x8x128xf32>
    %217 = vector.extract_strided_slice %206 {offsets = [0, 256], sizes = [16, 128], strides = [1, 1]} : vector<16x384xf32> to vector<16x128xf32>
    %218 = vector.shape_cast %188 : vector<128xf32> to vector<1x128xf32>
    %219 = vector.broadcast %218 : vector<1x128xf32> to vector<16x128xf32>
    %220 = arith.addf %217, %219 : vector<16x128xf32>
    %221 = vector.shape_cast %220 : vector<16x128xf32> to vector<2x8x128xf32>
    "tpu.trace_start"() <{level = 10 : i32, message = "bqd,bkd->bqk"}> : () -> ()
    %cst_60 = arith.constant dense<0.000000e+00> : vector<2x8x8xf32>
    %222 = tpu.matmul %211, %216, %cst_60 {dimension_numbers = #tpu.dot_dimension_numbers<[2], [2], [1], [1], [0, 0, 0, 1, 1, 1], [0], [0]>} : vector<2x8x128xf32>, vector<2x8x128xf32>, vector<2x8x8xf32> -> vector<2x8x8xf32>
    "tpu.trace_stop"() : () -> ()
    %223 = vector.broadcast %41 : vector<2x1x8xf32> to vector<2x8x8xf32>
    %224 = arith.addf %222, %223 : vector<2x8x8xf32>
    %cst_61 = arith.constant dense<0xFF800000> : vector<2x8xf32>
    %225 = vector.multi_reduction <maximumf>, %224, %cst_61 [2] : vector<2x8x8xf32> to vector<2x8xf32>
    %226 = vector.shape_cast %225 : vector<2x8xf32> to vector<2x8x1xf32>
    %227 = vector.broadcast %226 : vector<2x8x1xf32> to vector<2x8x8xf32>
    %228 = arith.subf %224, %227 : vector<2x8x8xf32>
    %229 = math.exp %228 : vector<2x8x8xf32>
    %cst_62 = arith.constant dense<0.000000e+00> : vector<2x8xf32>
    %230 = vector.multi_reduction <add>, %229, %cst_62 [2] : vector<2x8x8xf32> to vector<2x8xf32>
    %231 = vector.shape_cast %230 : vector<2x8xf32> to vector<2x8x1xf32>
    %232 = tpu.reciprocal %231 {approx = true} : vector<2x8x1xf32> -> vector<2x8x1xf32>
    %233 = vector.broadcast %232 : vector<2x8x1xf32> to vector<2x8x8xf32>
    %234 = arith.mulf %229, %233 : vector<2x8x8xf32>
    "tpu.trace_start"() <{level = 10 : i32, message = "bqk,bkd->bqd"}> : () -> ()
    %cst_63 = arith.constant dense<0.000000e+00> : vector<2x8x128xf32>
    %235 = tpu.matmul %234, %221, %cst_63 {dimension_numbers = #tpu.dot_dimension_numbers<[2], [1], [1], [2], [0, 0, 0, 1, 1, 2], [0], [0]>} : vector<2x8x8xf32>, vector<2x8x128xf32>, vector<2x8x128xf32> -> vector<2x8x128xf32>
    "tpu.trace_stop"() : () -> ()
    %236 = vector.shape_cast %235 : vector<2x8x128xf32> to vector<16x128xf32>
    %237 = arith.truncf %236 : vector<16x128xf32> to vector<16x128xbf16>
    %c1_64 = arith.constant 1 : index
    %c0_65 = arith.constant 0 : index
    %c0_66 = arith.constant 0 : index
    %238 = vector.load %arg7[%c1_64, %c0_65, %c0_66] : memref<2x128x128xbf16, #tpu.memory_space<vmem>>, vector<1x128x128xbf16>
    %239 = vector.shape_cast %238 : vector<1x128x128xbf16> to vector<128x128xbf16>
    %cst_67 = arith.constant dense<0.000000e+00> : vector<16x128xf32>
    %240 = tpu.matmul %237, %239, %cst_67 {dimension_numbers = #tpu.dot_dimension_numbers<[1], [0], [0], [1], [0, 0, 1, 1], [], []>} : vector<16x128xbf16>, vector<128x128xbf16>, vector<16x128xf32> -> vector<16x128xf32>
    %241 = vector.shape_cast %190 : vector<128xf32> to vector<1x128xf32>
    %242 = vector.broadcast %241 : vector<1x128xf32> to vector<16x128xf32>
    %243 = arith.addf %240, %242 : vector<16x128xf32>
    %244 = arith.addf %243, %180 : vector<16x128xf32>
    %cst_68 = arith.constant dense<0.000000e+00> : vector<16xf32>
    %245 = vector.multi_reduction <add>, %244, %cst_68 [1] : vector<16x128xf32> to vector<16xf32>
    %246 = vector.shape_cast %245 : vector<16xf32> to vector<16x1xf32>
    %cst_69 = arith.constant 1.280000e+02 : f32
    %247 = vector.broadcast %cst_69 : f32 to vector<16x1xf32>
    %248 = arith.divf %246, %247 : vector<16x1xf32>
    %249 = arith.mulf %244, %244 : vector<16x128xf32>
    %cst_70 = arith.constant dense<0.000000e+00> : vector<16xf32>
    %250 = vector.multi_reduction <add>, %249, %cst_70 [1] : vector<16x128xf32> to vector<16xf32>
    %251 = vector.shape_cast %250 : vector<16xf32> to vector<16x1xf32>
    %cst_71 = arith.constant 1.280000e+02 : f32
    %252 = vector.broadcast %cst_71 : f32 to vector<16x1xf32>
    %253 = arith.divf %251, %252 : vector<16x1xf32>
    %254 = arith.mulf %248, %248 : vector<16x1xf32>
    %255 = arith.subf %253, %254 : vector<16x1xf32>
    %256 = vector.broadcast %248 : vector<16x1xf32> to vector<16x128xf32>
    %257 = arith.subf %244, %256 : vector<16x128xf32>
    %cst_72 = arith.constant 9.99999974E-6 : f32
    %258 = vector.broadcast %cst_72 : f32 to vector<16x1xf32>
    %259 = arith.addf %255, %258 : vector<16x1xf32>
    %260 = math.rsqrt %259 : vector<16x1xf32>
    %261 = vector.broadcast %260 : vector<16x1xf32> to vector<16x128xf32>
    %262 = arith.mulf %257, %261 : vector<16x128xf32>
    %263 = vector.shape_cast %192 : vector<128xf32> to vector<1x128xf32>
    %264 = vector.broadcast %263 : vector<1x128xf32> to vector<16x128xf32>
    %265 = arith.mulf %262, %264 : vector<16x128xf32>
    %266 = vector.shape_cast %194 : vector<128xf32> to vector<1x128xf32>
    %267 = vector.broadcast %266 : vector<1x128xf32> to vector<16x128xf32>
    %268 = arith.addf %265, %267 : vector<16x128xf32>
    %269 = arith.truncf %268 : vector<16x128xf32> to vector<16x128xbf16>
    %c1_73 = arith.constant 1 : index
    %c0_74 = arith.constant 0 : index
    %c0_75 = arith.constant 0 : index
    %270 = vector.load %arg8[%c1_73, %c0_74, %c0_75] : memref<2x128x256xbf16, #tpu.memory_space<vmem>>, vector<1x128x256xbf16>
    %271 = vector.shape_cast %270 : vector<1x128x256xbf16> to vector<128x256xbf16>
    %cst_76 = arith.constant dense<0.000000e+00> : vector<16x256xf32>
    %272 = tpu.matmul %269, %271, %cst_76 {dimension_numbers = #tpu.dot_dimension_numbers<[1], [0], [0], [1], [0, 0, 1, 1], [], []>} : vector<16x128xbf16>, vector<128x256xbf16>, vector<16x256xf32> -> vector<16x256xf32>
    %273 = vector.broadcast %202 : vector<1x256xf32> to vector<16x256xf32>
    %274 = arith.addf %272, %273 : vector<16x256xf32>
    %275 = arith.mulf %274, %274 : vector<16x256xf32>
    %276 = arith.mulf %274, %275 : vector<16x256xf32>
    %cst_77 = arith.constant 4.471500e-02 : f32
    %277 = vector.broadcast %cst_77 : f32 to vector<16x256xf32>
    %278 = arith.mulf %277, %276 : vector<16x256xf32>
    %279 = arith.addf %274, %278 : vector<16x256xf32>
    %cst_78 = arith.constant 0.797884583 : f32
    %280 = vector.broadcast %cst_78 : f32 to vector<16x256xf32>
    %281 = arith.mulf %280, %279 : vector<16x256xf32>
    %282 = math.tanh %281 : vector<16x256xf32>
    %cst_79 = arith.constant 1.000000e+00 : f32
    %283 = vector.broadcast %cst_79 : f32 to vector<16x256xf32>
    %284 = arith.addf %283, %282 : vector<16x256xf32>
    %cst_80 = arith.constant 5.000000e-01 : f32
    %285 = vector.broadcast %cst_80 : f32 to vector<16x256xf32>
    %286 = arith.mulf %285, %284 : vector<16x256xf32>
    %287 = arith.mulf %274, %286 : vector<16x256xf32>
    %288 = arith.truncf %287 : vector<16x256xf32> to vector<16x256xbf16>
    %c1_81 = arith.constant 1 : index
    %c0_82 = arith.constant 0 : index
    %c0_83 = arith.constant 0 : index
    %289 = vector.load %arg9[%c1_81, %c0_82, %c0_83] : memref<2x256x128xbf16, #tpu.memory_space<vmem>>, vector<1x256x128xbf16>
    %290 = vector.shape_cast %289 : vector<1x256x128xbf16> to vector<256x128xbf16>
    %cst_84 = arith.constant dense<0.000000e+00> : vector<16x128xf32>
    %291 = tpu.matmul %288, %290, %cst_84 {dimension_numbers = #tpu.dot_dimension_numbers<[1], [0], [0], [1], [0, 0, 1, 1], [], []>} : vector<16x256xbf16>, vector<256x128xbf16>, vector<16x128xf32> -> vector<16x128xf32>
    %292 = vector.shape_cast %196 : vector<128xf32> to vector<1x128xf32>
    %293 = vector.broadcast %292 : vector<1x128xf32> to vector<16x128xf32>
    %294 = arith.addf %291, %293 : vector<16x128xf32>
    %295 = arith.addf %294, %268 : vector<16x128xf32>
    %cst_85 = arith.constant dense<0.000000e+00> : vector<16xf32>
    %296 = vector.multi_reduction <add>, %295, %cst_85 [1] : vector<16x128xf32> to vector<16xf32>
    %297 = vector.shape_cast %296 : vector<16xf32> to vector<16x1xf32>
    %cst_86 = arith.constant 1.280000e+02 : f32
    %298 = vector.broadcast %cst_86 : f32 to vector<16x1xf32>
    %299 = arith.divf %297, %298 : vector<16x1xf32>
    %300 = arith.mulf %295, %295 : vector<16x128xf32>
    %cst_87 = arith.constant dense<0.000000e+00> : vector<16xf32>
    %301 = vector.multi_reduction <add>, %300, %cst_87 [1] : vector<16x128xf32> to vector<16xf32>
    %302 = vector.shape_cast %301 : vector<16xf32> to vector<16x1xf32>
    %cst_88 = arith.constant 1.280000e+02 : f32
    %303 = vector.broadcast %cst_88 : f32 to vector<16x1xf32>
    %304 = arith.divf %302, %303 : vector<16x1xf32>
    %305 = arith.mulf %299, %299 : vector<16x1xf32>
    %306 = arith.subf %304, %305 : vector<16x1xf32>
    %307 = vector.broadcast %299 : vector<16x1xf32> to vector<16x128xf32>
    %308 = arith.subf %295, %307 : vector<16x128xf32>
    %cst_89 = arith.constant 9.99999974E-6 : f32
    %309 = vector.broadcast %cst_89 : f32 to vector<16x1xf32>
    %310 = arith.addf %306, %309 : vector<16x1xf32>
    %311 = math.rsqrt %310 : vector<16x1xf32>
    %312 = vector.broadcast %311 : vector<16x1xf32> to vector<16x128xf32>
    %313 = arith.mulf %308, %312 : vector<16x128xf32>
    %314 = vector.shape_cast %198 : vector<128xf32> to vector<1x128xf32>
    %315 = vector.broadcast %314 : vector<1x128xf32> to vector<16x128xf32>
    %316 = arith.mulf %313, %315 : vector<16x128xf32>
    %317 = vector.shape_cast %200 : vector<128xf32> to vector<1x128xf32>
    %318 = vector.broadcast %317 : vector<1x128xf32> to vector<16x128xf32>
    %319 = arith.addf %316, %318 : vector<16x128xf32>
    %320 = vector.shape_cast %319 : vector<16x128xf32> to vector<2x8x128xf32>
    %321 = vector.extract_strided_slice %320 {offsets = [0, 0, 0], sizes = [2, 1, 128], strides = [1, 1, 1]} : vector<2x8x128xf32> to vector<2x1x128xf32>
    %322 = vector.shape_cast %321 : vector<2x1x128xf32> to vector<2x128xf32>
    %323 = arith.truncf %322 : vector<2x128xf32> to vector<2x128xbf16>
    %c0_90 = arith.constant 0 : index
    %c0_91 = arith.constant 0 : index
    %c0_92 = arith.constant 0 : index
    %324 = vector.load %arg10[%c0_90, %c0_91, %c0_92] : memref<3x128x128xbf16, #tpu.memory_space<vmem>>, vector<1x128x128xbf16>
    %325 = vector.shape_cast %324 : vector<1x128x128xbf16> to vector<128x128xbf16>
    %cst_93 = arith.constant dense<0.000000e+00> : vector<2x128xf32>
    %326 = tpu.matmul %323, %325, %cst_93 {dimension_numbers = #tpu.dot_dimension_numbers<[1], [0], [0], [1], [0, 0, 1, 1], [], []>} : vector<2x128xbf16>, vector<128x128xbf16>, vector<2x128xf32> -> vector<2x128xf32>
    %327 = vector.shape_cast %6 : vector<128xf32> to vector<1x128xf32>
    %328 = vector.broadcast %327 : vector<1x128xf32> to vector<2x128xf32>
    %329 = arith.addf %326, %328 : vector<2x128xf32>
    %330 = math.tanh %329 : vector<2x128xf32>
    %cst_94 = arith.constant dense<0.000000e+00> : vector<2xf32>
    %331 = vector.multi_reduction <add>, %330, %cst_94 [1] : vector<2x128xf32> to vector<2xf32>
    %332 = vector.shape_cast %331 : vector<2xf32> to vector<2x1xf32>
    %cst_95 = arith.constant 1.280000e+02 : f32
    %333 = vector.broadcast %cst_95 : f32 to vector<2x1xf32>
    %334 = arith.divf %332, %333 : vector<2x1xf32>
    %335 = arith.mulf %330, %330 : vector<2x128xf32>
    %cst_96 = arith.constant dense<0.000000e+00> : vector<2xf32>
    %336 = vector.multi_reduction <add>, %335, %cst_96 [1] : vector<2x128xf32> to vector<2xf32>
    %337 = vector.shape_cast %336 : vector<2xf32> to vector<2x1xf32>
    %cst_97 = arith.constant 1.280000e+02 : f32
    %338 = vector.broadcast %cst_97 : f32 to vector<2x1xf32>
    %339 = arith.divf %337, %338 : vector<2x1xf32>
    %340 = arith.mulf %334, %334 : vector<2x1xf32>
    %341 = arith.subf %339, %340 : vector<2x1xf32>
    %342 = vector.broadcast %334 : vector<2x1xf32> to vector<2x128xf32>
    %343 = arith.subf %330, %342 : vector<2x128xf32>
    %cst_98 = arith.constant 9.99999974E-6 : f32
    %344 = vector.broadcast %cst_98 : f32 to vector<2x1xf32>
    %345 = arith.addf %341, %344 : vector<2x1xf32>
    %346 = math.rsqrt %345 : vector<2x1xf32>
    %347 = vector.broadcast %346 : vector<2x1xf32> to vector<2x128xf32>
    %348 = arith.mulf %343, %347 : vector<2x128xf32>
    %349 = vector.shape_cast %8 : vector<128xf32> to vector<1x128xf32>
    %350 = vector.broadcast %349 : vector<1x128xf32> to vector<2x128xf32>
    %351 = arith.mulf %348, %350 : vector<2x128xf32>
    %352 = vector.shape_cast %10 : vector<128xf32> to vector<1x128xf32>
    %353 = vector.broadcast %352 : vector<1x128xf32> to vector<2x128xf32>
    %354 = arith.addf %351, %353 : vector<2x128xf32>
    %355 = arith.truncf %354 : vector<2x128xf32> to vector<2x128xbf16>
    %c1_99 = arith.constant 1 : index
    %c0_100 = arith.constant 0 : index
    %c0_101 = arith.constant 0 : index
    %356 = vector.load %arg10[%c1_99, %c0_100, %c0_101] : memref<3x128x128xbf16, #tpu.memory_space<vmem>>, vector<1x128x128xbf16>
    %357 = vector.shape_cast %356 : vector<1x128x128xbf16> to vector<128x128xbf16>
    %cst_102 = arith.constant dense<0.000000e+00> : vector<2x128xf32>
    %358 = tpu.matmul %355, %357, %cst_102 {dimension_numbers = #tpu.dot_dimension_numbers<[1], [0], [0], [1], [0, 0, 1, 1], [], []>} : vector<2x128xbf16>, vector<128x128xbf16>, vector<2x128xf32> -> vector<2x128xf32>
    %359 = vector.shape_cast %12 : vector<128xf32> to vector<1x128xf32>
    %360 = vector.broadcast %359 : vector<1x128xf32> to vector<2x128xf32>
    %361 = arith.addf %358, %360 : vector<2x128xf32>
    %362 = arith.truncf %361 : vector<2x128xf32> to vector<2x128xbf16>
    %c2 = arith.constant 2 : index
    %c0_103 = arith.constant 0 : index
    %c0_104 = arith.constant 0 : index
    %363 = vector.load %arg10[%c2, %c0_103, %c0_104] : memref<3x128x128xbf16, #tpu.memory_space<vmem>>, vector<1x128x128xbf16>
    %364 = vector.shape_cast %363 : vector<1x128x128xbf16> to vector<128x128xbf16>
    %cst_105 = arith.constant dense<0.000000e+00> : vector<2x128xf32>
    %365 = tpu.matmul %362, %364, %cst_105 {dimension_numbers = #tpu.dot_dimension_numbers<[1], [0], [0], [1], [0, 0, 1, 1], [], []>} : vector<2x128xbf16>, vector<128x128xbf16>, vector<2x128xf32> -> vector<2x128xf32>
    %366 = vector.shape_cast %14 : vector<128xf32> to vector<1x128xf32>
    %367 = vector.broadcast %366 : vector<1x128xf32> to vector<2x128xf32>
    %368 = arith.addf %365, %367 : vector<2x128xf32>
    %369 = vector.shape_cast %368 : vector<2x128xf32> to vector<2x1x128xf32>
    %c0_106 = arith.constant 0 : index
    %c0_107 = arith.constant 0 : index
    %c0_108 = arith.constant 0 : index
    %370 = vector.load %arg11[%c0_106, %c0_107, %c0_108] : memref<2x1x128xf32, #tpu.memory_space<vmem>>, vector<2x1x128xf32>
    tpu.vector_store %arg11[%c0_106, %c0_107, %c0_108], %369 {strides = array<i32>} : memref<2x1x128xf32, #tpu.memory_space<vmem>>, vector<2x1x128xf32>,
    return
  }
  func.func @transform_0(%arg0: i32) -> (i32, i32, i32) {
    %c0_i32 = arith.constant 0 : i32
    %c0_i32_0 = arith.constant 0 : i32
    %c0_i32_1 = arith.constant 0 : i32
    return %arg0, %c0_i32, %c0_i32_0 : i32, i32, i32
  }
  func.func @transform_1(%arg0: i32) -> (i32, i32, i32) {
    %c0_i32 = arith.constant 0 : i32
    %c0_i32_0 = arith.constant 0 : i32
    %c0_i32_1 = arith.constant 0 : i32
    return %arg0, %c0_i32, %c0_i32_0 : i32, i32, i32
  }
  func.func @transform_2(%arg0: i32) -> (i32, i32) {
    %c0_i32 = arith.constant 0 : i32
    %c0_i32_0 = arith.constant 0 : i32
    %c0_i32_1 = arith.constant 0 : i32
    return %c0_i32, %c0_i32_0 : i32, i32
  }
  func.func @transform_3(%arg0: i32) -> (i32, i32, i32) {
    %c0_i32 = arith.constant 0 : i32
    %c0_i32_0 = arith.constant 0 : i32
    %c0_i32_1 = arith.constant 0 : i32
    %c0_i32_2 = arith.constant 0 : i32
    return %c0_i32, %c0_i32_0, %c0_i32_1 : i32, i32, i32
  }
  func.func @transform_4(%arg0: i32) -> (i32, i32, i32) {
    %c0_i32 = arith.constant 0 : i32
    %c0_i32_0 = arith.constant 0 : i32
    %c0_i32_1 = arith.constant 0 : i32
    %c0_i32_2 = arith.constant 0 : i32
    return %c0_i32, %c0_i32_0, %c0_i32_1 : i32, i32, i32
  }
  func.func @transform_5(%arg0: i32) -> (i32, i32, i32) {
    %c0_i32 = arith.constant 0 : i32
    %c0_i32_0 = arith.constant 0 : i32
    %c0_i32_1 = arith.constant 0 : i32
    %c0_i32_2 = arith.constant 0 : i32
    return %c0_i32, %c0_i32_0, %c0_i32_1 : i32, i32, i32
  }
  func.func @transform_6(%arg0: i32) -> (i32, i32, i32) {
    %c0_i32 = arith.constant 0 : i32
    %c0_i32_0 = arith.constant 0 : i32
    %c0_i32_1 = arith.constant 0 : i32
    %c0_i32_2 = arith.constant 0 : i32
    return %c0_i32, %c0_i32_0, %c0_i32_1 : i32, i32, i32
  }
  func.func @transform_7(%arg0: i32) -> (i32, i32, i32) {
    %c0_i32 = arith.constant 0 : i32
    %c0_i32_0 = arith.constant 0 : i32
    %c0_i32_1 = arith.constant 0 : i32
    %c0_i32_2 = arith.constant 0 : i32
    return %c0_i32, %c0_i32_0, %c0_i32_1 : i32, i32, i32
  }
  func.func @transform_8(%arg0: i32) -> (i32, i32, i32) {
    %c0_i32 = arith.constant 0 : i32
    %c0_i32_0 = arith.constant 0 : i32
    %c0_i32_1 = arith.constant 0 : i32
    %c0_i32_2 = arith.constant 0 : i32
    return %c0_i32, %c0_i32_0, %c0_i32_1 : i32, i32, i32
  }
  func.func @transform_9(%arg0: i32) -> (i32, i32, i32) {
    %c0_i32 = arith.constant 0 : i32
    %c0_i32_0 = arith.constant 0 : i32
    %c0_i32_1 = arith.constant 0 : i32
    %c0_i32_2 = arith.constant 0 : i32
    return %c0_i32, %c0_i32_0, %c0_i32_1 : i32, i32, i32
  }
  func.func @transform_10(%arg0: i32) -> (i32, i32, i32) {
    %c0_i32 = arith.constant 0 : i32
    %c0_i32_0 = arith.constant 0 : i32
    %c0_i32_1 = arith.constant 0 : i32
    return %arg0, %c0_i32, %c0_i32_0 : i32, i32, i32
  }
}

</mosaic_0001>

<bundles_post_ra>
// kernel: commonlit_roberta_forward.1
= control target key start
LH: loop header
LB: loop body
LE: loop exit
PB: predicated region body
PF: predicated region fallthrough
CT: control target
= control target key end

     0   :  { %15 = vsyncpa [#allocation3], 0  ;;  %s4259_s0 = inlined_call_operand.vmem [shape: f32[2,8,128], index: 0, kind: input, shape index: {}]   ;;  %s4260_s1 = inlined_call_operand.vmem [shape: f32[2,1,8], index: 1, kind: input, shape index: {}]   ;;  %s4261_s2 = inlined_call_operand.hbm [shape: f32[8,128], index: 2, kind: input, shape index: {}]   ;;  %s4262_s3 = inlined_call_operand.vmem [shape: f32[2,9,128], index: 3, kind: input, shape index: {}]   ;;  %s4263_s4 = inlined_call_operand.vmem [shape: f32[2,1,256], index: 4, kind: input, shape index: {}]   ;;  %s4264_s5 = inlined_call_operand.vmem [shape: bf16[2,128,384], index: 5, kind: input, shape index: {}]   ;;  %s4265_s6 = inlined_call_operand.hbm [shape: bf16[2,128,128], index: 6, kind: input, shape index: {}]   ;;  %s4266_s7 = inlined_call_operand.hbm [shape: bf16[2,128,256], index: 7, kind: input, shape index: {}]   ;;  %s4267_s8 = inlined_call_operand.hbm [shape: bf16[2,256,128], index: 8, kind: input, shape index: {}]   ;;  %s4268_s9 = inlined_call_operand.hbm [shape: bf16[3,128,128], index: 9, kind: input, shape index: {}]   ;;  %s4269_s10 = inlined_call_operand.vmem [shape: f32[2,1,128], index: 10, kind: output, shape index: {}]  }
   0x1   :  { %16 = vsyncpa [#allocation5], 0 }
   0x2   :  { %17 = vsyncpa [#allocation8], 0  ;;  %s3687_s13 = smov [#allocation4]   ;;  %s3571_s17 = scalar_lea.hbm %s4265_s6, 2048 }
   0x3   :  { %s43_s14 = sshll.u32 %s3687_s13, 4  ;;  %p3572_p0 = scmp.ne.s32.totalorder %s4265_s6, %s3571_s17  ;;  %s44_s14 = int_to_ptr.vmem [resolvable:$true] %s43_s14 }
   0x4   :  { %p3575_p1 = scmp.lt.u32.totalorder %s3571_s17, %s4265_s6 }
   0x6   :  { %p3577_p2 = pnand %p3575_p1, %p3572_p0 }
   0x8   :  { %3580 = shalt.err (!%p3577_p2)
}
   0x9   :  { %s3581_s22 = scalar_lea.vmem %s44_s14, 2048  ;;  %p3586_p4 = scmp.lt.s32.totalorder %s44_s14, %s44_s14 }
   0xa   :  { %p3582_p3 = scmp.ne.s32.totalorder %s44_s14, %s3581_s22  ;;  %p3587_p5 = scmp.lt.s32.totalorder %s3581_s22, %s3581_s22 }
   0xc   :  { %p3588_p6 = por %p3587_p5, %p3586_p4 }
   0xe   :  { %p3589_p7 = pnand %p3588_p6, %p3582_p3 }
  0x10   :  { %3592 = shalt.err (!%p3589_p7)
}
  0x11   :  { %s3688_s23 = smov 64   ;;  %s3689_s24 = smov 4  }
  0x12   :  { %49 = dma.hbm_to_vmem [thread:$0]  %s4265_s6, 2048, %s44_s14, [#allocation5], %s3688_s23, %s3688_s23, %s3689_s24  }
  0x13   :  { %s3690_s27 = smov [#allocation7]   ;;  %s3691_s29 = smov [#allocation2]  }
  0x14   :  { %s67_s28 = sshll.u32 %s3690_s27, 4  ;;  %s28_s30 = sshll.u32 %s3691_s29, 4  ;;  %s68_s28 = int_to_ptr.vmem [resolvable:$true] %s67_s28  ;;  %s29_s30 = int_to_ptr.vmem [resolvable:$true] %s28_s30 }
  0x15   :  { %s3593_s13 = scalar_lea.hbm %s4267_s8, 4096 }
  0x16   :  { %p3594_p8 = scmp.ne.s32.totalorder %s4267_s8, %s3593_s13  ;;  %p3597_p9 = scmp.lt.u32.totalorder %s3593_s13, %s4267_s8 }
  0x18   :  { %p3599_p10 = pnand %p3597_p9, %p3594_p8 }
  0x1a   :  { %3602 = shalt.err (!%p3599_p10)
}
  0x1b   :  { %s3603_s6 = scalar_lea.vmem %s68_s28, 4096  ;;  %p3608_p12 = scmp.lt.s32.totalorder %s68_s28, %s68_s28 }
  0x1c   :  { %p3604_p11 = scmp.ne.s32.totalorder %s68_s28, %s3603_s6  ;;  %p3609_p13 = scmp.lt.s32.totalorder %s3603_s6, %s3603_s6 }
  0x1e   :  { %p3610_p0 = por %p3609_p13, %p3608_p12 }
  0x20   :  { %p3611_p1 = pnand %p3610_p0, %p3604_p11 }
  0x22   :  { %3614 = shalt.err (!%p3611_p1)
}
  0x23   :  { %73 = dma.hbm_to_vmem [thread:$0]  %s4267_s8, 4096, %s68_s28, [#allocation8], %s3688_s23, %s3688_s23, %s3689_s24  }
  0x24   :  { %s3615_s22 = scalar_lea.hbm %s4261_s2, 128 }
  0x25   :  { %p3616_p2 = scmp.ne.s32.totalorder %s4261_s2, %s3615_s22  ;;  %p3619_p3 = scmp.lt.u32.totalorder %s3615_s22, %s4261_s2 }
  0x27   :  { %p3621_p4 = pnand %p3619_p3, %p3616_p2 }
  0x29   :  { %3624 = shalt.err (!%p3621_p4)
}
  0x2a   :  { %s3625_s11 = scalar_lea.vmem %s29_s30, 128  ;;  %p3630_p6 = scmp.lt.s32.totalorder %s29_s30, %s29_s30 }
  0x2b   :  { %p3626_p5 = scmp.ne.s32.totalorder %s29_s30, %s3625_s11  ;;  %p3631_p7 = scmp.lt.s32.totalorder %s3625_s11, %s3625_s11 }
  0x2d   :  { %p3632_p8 = por %p3631_p7, %p3630_p6 }
  0x2f   :  { %p3633_p9 = pnand %p3632_p8, %p3626_p5 }
  0x31   :  { %3636 = shalt.err (!%p3633_p9)
}
  0x32   :  { %31 = dma.hbm_to_vmem [thread:$0]  %s4261_s2, 128, %s29_s30, [#allocation3]  }
  0x33   :  { %s3692_s12 = smov [#allocation6]   ;;  %s3637_s17 = scalar_lea.hbm %s4266_s7, 4096 }
  0x34   :  { %s55_s13 = sshll.u32 %s3692_s12, 4  ;;  %p3638_p10 = scmp.ne.s32.totalorder %s4266_s7, %s3637_s17  ;;  %s56_s13 = int_to_ptr.vmem [resolvable:$true] %s55_s13 }
  0x35   :  { %p3641_p11 = scmp.lt.u32.totalorder %s3637_s17, %s4266_s7 }
  0x37   :  { %p3643_p12 = pnand %p3641_p11, %p3638_p10 }
  0x39   :  { %3646 = shalt.err (!%p3643_p12)
}
  0x3a   :  { %s3647_s20 = scalar_lea.vmem %s56_s13, 4096  ;;  %p3652_p0 = scmp.lt.s32.totalorder %s56_s13, %s56_s13 }
  0x3b   :  { %p3648_p13 = scmp.ne.s32.totalorder %s56_s13, %s3647_s20  ;;  %p3653_p1 = scmp.lt.s32.totalorder %s3647_s20, %s3647_s20 }
  0x3d   :  { %p3654_p2 = por %p3653_p1, %p3652_p0 }
  0x3f   :  { %p3655_p3 = pnand %p3654_p2, %p3648_p13 }
  0x41   :  { %3658 = shalt.err (!%p3655_p3)
}
  0x42   :  { %s3693_s2 = smov 128   ;;  %s3694_s30 = smov 8  }
  0x43   :  { %61 = dma.hbm_to_vmem [thread:$0]  %s4266_s7, 4096, %s56_s13, [#allocation5], %s3693_s2, %s3693_s2, %s3694_s30  }
  0x44   :  { %s3695_s25 = smov [#allocation9]   ;;  %s3659_s11 = scalar_lea.hbm %s4268_s9, 3072 }
  0x45   :  { %s79_s26 = sshll.u32 %s3695_s25, 4  ;;  %p3660_p4 = scmp.ne.s32.totalorder %s4268_s9, %s3659_s11  ;;  %s80_s26 = int_to_ptr.vmem [resolvable:$true] %s79_s26 }
  0x46   :  { %p3663_p5 = scmp.lt.u32.totalorder %s3659_s11, %s4268_s9 }
  0x48   :  { %p3665_p6 = pnand %p3663_p5, %p3660_p4 }
  0x4a   :  { %3668 = shalt.err (!%p3665_p6)
}
  0x4b   :  { %s3669_s16 = scalar_lea.vmem %s80_s26, 3072  ;;  %p3674_p8 = scmp.lt.s32.totalorder %s80_s26, %s80_s26 }
  0x4c   :  { %p3670_p7 = scmp.ne.s32.totalorder %s80_s26, %s3669_s16  ;;  %p3675_p9 = scmp.lt.s32.totalorder %s3669_s16, %s3669_s16 }
  0x4e   :  { %p3676_p10 = por %p3675_p9, %p3674_p8 }
  0x50   :  { %p3677_p11 = pnand %p3676_p10, %p3670_p7 }
  0x52   :  { %3680 = shalt.err (!%p3677_p11)
}
  0x53   :  { %85 = dma.hbm_to_vmem [thread:$0]  %s4268_s9, 3072, %s80_s26, [#allocation8], %s3688_s23, %s3688_s23, %s3689_s24  }
  0x54   :  { %3681 = dma.done.wait [#allocation3], 128  }
  0x55   :  { %3682 = vsyncadd [#allocation3], 4294967168 }
  0x56   :  { %3683 = dma.done.wait [#allocation5], 6144  }
  0x57   :  { %3684 = vsyncadd [#allocation5], 4294961152 }
  0x58   :  { %3685 = dma.done.wait [#allocation8], 7168  }
  0x59   :  { %3686 = vsyncadd [#allocation8], 4294960128  ;;  %v3696_v0 = vmov 0.0   ;;  %v3828_v1 = vld [vmem:[%s4259_s0] sm:$0xff]  ;;  %v3833_v2 = vld [vmem:[%s4259_s0 + $0x8] sm:$0xff]  ;;  %v3697_v26 = vmov 0   ;;  %v132_v42 = vlaneseq }
  0x5a   :  { %3137 = vmatprep.subr.bf16.mxu1 %v3696_v0  ;;  %105 = vadd.xlane.f32.xlu0 %v3828_v1  ;;  %v112_v3 = vmul.f32 %v3828_v1, %v3828_v1  ;;  %v3330_v4 = vld [vmem:[%s4264_s5 + $0x4] ss:$12 sps:$4 sm:$0xff]   ;;  %v113_v5 = vmul.f32 %v3833_v2, %v3833_v2  ;;  %v3332_v6 = vld [vmem:[%s4264_s5] ss:$12 sps:$4 sm:$0xff]   ;;  %v3333_v7 = vld [vmem:[%s4264_s5 + $0x8] ss:$12 sps:$4 sm:$0xff]  }
  0x5b   :  { %310 = vmatprep.subr.bf16.mxu0 %v3330_v4  ;;  %3138 = vmatpush3.bf16.msra.mxu1 %v3333_v7  ;;  %v3334_v8 = vld [vmem:[%s4264_s5 + $0x1c] ss:$12 sps:$4 sm:$0xff]   ;;  %v3336_v9 = vld [vmem:[%s4264_s5 + $0x18] ss:$12 sps:$4 sm:$0xff]   ;;  %v3337_v10 = vld [vmem:[%s4264_s5 + $0x20] ss:$12 sps:$4 sm:$0xff]  }
  0x5c   :  { %114 = vadd.xlane.f32.xlu1 %v112_v3  ;;  %311 = vmatpush1.bf16.msra.mxu0 %v3332_v6  ;;  %v3338_v11 = vld [vmem:[%s4264_s5 + $0x34] ss:$12 sps:$4 sm:$0xff]   ;;  %v3340_v12 = vld [vmem:[%s4264_s5 + $0x30] ss:$12 sps:$4 sm:$0xff]   ;;  %v3341_v13 = vld [vmem:[%s4264_s5 + $0x38] ss:$12 sps:$4 sm:$0xff]  }
  0x5d   :  { %3139 = vmatprep.subr.bf16.mxu1 %v3696_v0  ;;  %312 = vmatprep.subr.bf16.mxu0 %v3334_v8  ;;  %v3342_v14 = vld [vmem:[%s4264_s5 + $0x4c] ss:$12 sps:$4 sm:$0xff]   ;;  %v3344_v15 = vld [vmem:[%s4264_s5 + $0x48] ss:$12 sps:$4 sm:$0xff]   ;;  %v3345_v16 = vld [vmem:[%s4264_s5 + $0x50] ss:$12 sps:$4 sm:$0xff]  }
  0x5e   :  { %107 = vadd.xlane.f32.xlu0 %v3833_v2  ;;  %v3346_v17 = vld [vmem:[%s4264_s5 + $0x64] ss:$12 sps:$4 sm:$0xff]   ;;  %v3348_v18 = vld [vmem:[%s4264_s5 + $0x60] ss:$12 sps:$4 sm:$0xff]   ;;  %v3349_v19 = vld [vmem:[%s4264_s5 + $0x68] ss:$12 sps:$4 sm:$0xff]   ;;  %342 = vmatprep.mubr.bf16.mxu0 %v3697_v26 }
  0x5f   :  { %3140 = vmatpush3.bf16.msra.mxu1 %v3337_v10  ;;  %v3350_v20 = vld [vmem:[%s4264_s5 + $0x7c] ss:$12 sps:$4 sm:$0xff]   ;;  %v3352_v21 = vld [vmem:[%s4264_s5 + $0x78] ss:$12 sps:$4 sm:$0xff]   ;;  %v3353_v22 = vld [vmem:[%s4264_s5 + $0x80] ss:$12 sps:$4 sm:$0xff]  }
  0x60   :  { %116 = vadd.xlane.f32.xlu1 %v113_v5  ;;  %313 = vmatpush1.bf16.msra.mxu0 %v3336_v9  ;;  %v3354_v23 = vld [vmem:[%s4264_s5 + $0x94] ss:$12 sps:$4 sm:$0xff]   ;;  %v3356_v24 = vld [vmem:[%s4264_s5 + $0x90] ss:$12 sps:$4 sm:$0xff]   ;;  %v3357_v25 = vld [vmem:[%s4264_s5 + $0x98] ss:$12 sps:$4 sm:$0xff]  }
  0x61   :  { %3141 = vmatprep.subr.bf16.mxu1 %v3696_v0  ;;  %314 = vmatprep.subr.bf16.mxu0 %v3338_v11  ;;  %vm3698_vm0 = vmmov 0   ;;  %v3358_v27 = vld [vmem:[%s4264_s5 + $0xac] ss:$12 sps:$4 sm:$0xff]   ;;  %v3360_v28 = vld [vmem:[%s4264_s5 + $0xa8] ss:$12 sps:$4 sm:$0xff]   ;;  %v3925_v45 = vshrl.u32 %v132_v42, 7 }
  0x62   :  { %3153 = vmatprep.mubr.msk.bf16.mxu1 %vm3698_vm0, %v3696_v0  ;;  %v3361_v29 = vld [vmem:[%s4264_s5 + $0xb0] ss:$12 sps:$4 sm:$0xff]   ;;  %v102_v47 = vld [vmem:[#allocation2] sm:$0xff]  ;;  %vm564_vm1 = vcmask 64512   ;;  %v3362_v42 = vld [vmem:[#allocation4] sm:$0xff]   ;;  %vm2444_vm2 = vcmask 1041409  }
  0x63   :  { %3142 = vmatpush3.bf16.msra.mxu1 %v3341_v13  ;;  %v3928_v46 = vsub.s32 0, %v3925_v45  ;;  %v3933_v52 = vsub.s32 1, %v3925_v45  ;;  %v3948_v62 = vsub.s32 2, %v3925_v45  ;;  %v3953_v63 = vld [vmem:[%s4262_s3] sm:$0xff]  ;;  %vm2537_vm3 = vcmask 1041408  }
  0x64   :  { %315 = vmatpush1.bf16.msra.mxu0 %v3340_v12  ;;  %3143 = vmatprep.subr.bf16.mxu1 %v3696_v0 }
  0x65   :  { %316 = vmatprep.subr.bf16.mxu0 %v3342_v14  ;;  %v135_v51 = vrot.slane %v102_v47, %v3928_v46  ;;  %v141_v57 = vrot.slane %v102_v47, %v3933_v52  ;;  %v397_v5 = vrot.slane %v3953_v63, %v3928_v46  ;;  %v3363_v47 = vld [vmem:[#allocation4 + $0x8] sm:$0xff]  }
  0x67   :  { %3144 = vmatpush3.bf16.msra.mxu1 %v3345_v16 }
  0x68   :  { %317 = vmatpush1.bf16.msra.mxu0 %v3344_v15  ;;  %3145 = vmatprep.subr.bf16.mxu1 %v3696_v0 }
  0x69   :  { %318 = vmatprep.subr.bf16.mxu0 %v3346_v17 }
  0x6b   :  { %3146 = vmatpush3.bf16.msra.mxu1 %v3349_v19 }
  0x6c   :  { %319 = vmatpush1.bf16.msra.mxu0 %v3348_v18  ;;  %3147 = vmatprep.subr.bf16.mxu1 %v3696_v0  ;;  %v3971_v18 = vld [vmem:[%s4260_s1] ss:$0 sm:$0xff] }
  0x6d   :  { %320 = vmatprep.subr.bf16.mxu0 %v3350_v20 }
  0x6f   :  { %3148 = vmatpush3.bf16.msra.mxu1 %v3353_v22  ;;  %v3977_v22 = vld [vmem:[%s4260_s1 + $0x1] ss:$0 sm:$0xff] }
  0x70   :  { %321 = vmatpush1.bf16.msra.mxu0 %v3352_v21  ;;  %3149 = vmatprep.subr.bf16.mxu1 %v3696_v0 }
  0x71   :  { %322 = vmatprep.subr.bf16.mxu0 %v3354_v23 }
  0x73   :  { %3150 = vmatpush3.bf16.msra.mxu1 %v3357_v25 }
  0x74   :  { %323 = vmatpush1.bf16.msra.mxu0 %v3356_v24  ;;  %3151 = vmatprep.subr.bf16.mxu1 %v3696_v0 }
  0x75   :  { %324 = vmatprep.subr.bf16.mxu0 %v3358_v27 }
  0x77   :  { %3152 = vmatpush3.bf16.msra.mxu1 %v3361_v29 }
  0x78   :  { %325 = vmatpush1.bf16.msra.mxu0 %v3360_v28  ;;  %3157 = vmatprep.subr.mxu1 %v3696_v0 }
  0x79   :  { %3167 = vmatprep.subr.mxu0 %v3696_v0 }
  0xe7   :  { %v106_v30 = vpop.xlane.xlu0 %105 }
  0xe8   :  { %v110_v31 = vmul.f32 0.0078125, %v106_v30 }
  0xe9   :  { %v115_v32 = vpop.xlane.xlu1 %114 }
  0xea   :  { %v120_v33 = vmul.f32 %v110_v31, %v110_v31  ;;  %v118_v34 = vmul.f32 0.0078125, %v115_v32  ;;  %v124_v48 = vsub.f32 %v3828_v1, %v110_v31  ;;  %v409_v1 = vrot.slane %v3953_v63, %v3948_v62 }
  0xeb   :  { %v108_v35 = vpop.xlane.xlu0 %107 }
  0xec   :  { %v122_v36 = vsub.f32 %v118_v34, %v120_v33  ;;  %v111_v37 = vmul.f32 0.0078125, %v108_v35 }
  0xed   :  { %v117_v38 = vpop.xlane.xlu1 %116 }
  0xee   :  { %v126_v39 = vadd.f32 1e-05, %v122_v36  ;;  %v121_v40 = vmul.f32 %v111_v37, %v111_v37  ;;  %v119_v41 = vmul.f32 0.0078125, %v117_v38  ;;  %v125_v53 = vsub.f32 %v3833_v2, %v111_v37 }
  0xef   :  { %v403_v2 = vrot.slane %v3953_v63, %v3933_v52 }
  0xf0   :  { %3514 = vrsqrt.f32 %v126_v39  ;;  %v123_v43 = vsub.f32 %v119_v41, %v121_v40 }
  0xf2   :  { %v127_v44 = vadd.f32 1e-05, %v123_v43 }
  0xf4   :  { %3516 = vrsqrt.f32 %v127_v44 }
  0xfa   :  { %v3515_v49 = vpop.eup %3514 }
  0xfb   :  { %v130_v50 = vmul.f32 %v3515_v49, %v124_v48  ;;  %v3364_v49 = vld [vmem:[#allocation4 + $0x10] sm:$0xff]  }
  0xfd   :  { %v136_v56 = vmul.f32 %v135_v51, %v130_v50  ;;  %v3365_v50 = vld [vmem:[#allocation4 + $0x18] sm:$0xff]  }
  0xfe   :  { %v3517_v54 = vpop.eup %3516 }
  0xff   :  { %v131_v55 = vmul.f32 %v3517_v54, %v125_v53  ;;  %v3937_v59 = vadd.f32 %v141_v57, %v136_v56  ;;  %v3367_v53 = vld [vmem:[#allocation4 + $0x28] sm:$0xff]   ;;  %v3368_v54 = vld [vmem:[#allocation4 + $0x30] sm:$0xff]  }
 0x101   :  { %v137_v58 = vmul.f32 %v135_v51, %v131_v55  ;;  %v3366_v51 = vld [vmem:[#allocation4 + $0x20] sm:$0xff]   ;;  %v3369_v55 = vld [vmem:[#allocation4 + $0x38] sm:$0xff]  }
 0x103   :  { %v3939_v60 = vadd.f32 %v141_v57, %v137_v58 }
 0x105   :  { %v149_v61 = vpack.c.bf16 %v3939_v60, %v3937_v59 }
 0x107   :  { %343 = vmatmul.mubr.bf16.vlgmr.msra.gmra.mrb[0].mxu0 %v149_v61  ;;  %3154 = vmatmul.mubr.bf16.vlgmr.msra.gmra.mrb[0].mxu1 %v149_v61 }
 0x108   :  { %3159 = vmatprep.mubr.msk.f32.mxu1 %vm3698_vm0, %v3696_v0  ;;  %3169 = vmatprep.mubr.msk.f32.mxu0 %vm3698_vm0, %v3696_v0 }
 0x1da   :  { %v344_v3 = vpop.f32.mrb[0].mxu0  ;;  %v387_v4 = vpop.f32.mrb[0].mxu1 }
 0x1db   :  { %v410_v6 = vadd.f32 %v409_v1, %v387_v4  ;;  %v346_v7 = vpop.f32.mrb[1].mxu0  ;;  %v3155_v8 = vpop.f32.mrb[1].mxu1  ;;  %v398_v14 = vadd.f32 %v397_v5, %v344_v3  ;;  %v3372_v3 = vld [vmem:[#allocation6 + $0x4] ss:$8 sps:$4 sm:$0xff]   ;;  %v3997_v4 = vsub.s32 3, %v3925_v45 }
 0x1dc   :  { %v404_v9 = vadd.f32 %v403_v2, %v346_v7  ;;  %v348_v10 = vpop.f32.mrb[2].mxu0  ;;  %v390_v11 = vpop.f32.mrb[2].mxu1 }
 0x1dd   :  { %v350_v12 = vpop.f32.mrb[3].mxu0  ;;  %v3156_v13 = vpop.f32.mrb[3].mxu1  ;;  %3168 = vmatpush3.msra.mxu0 %v410_v6  ;;  %v399_v16 = vadd.f32 %v397_v5, %v348_v10  ;;  %v411_v17 = vadd.f32 %v409_v1, %v390_v11  ;;  %v753_v5 = vrot.slane %v3953_v63, %v3997_v4 }
 0x1de   :  { %3158 = vmatpush3.xpose.msra.mxu1 %v404_v9  ;;  %3177 = vmatprep.subr.bf16.mxu0 %v3696_v0  ;;  %v405_v15 = vadd.f32 %v403_v2, %v350_v12  ;;  %v3370_v2 = vld [vmem:[#allocation6] ss:$8 sps:$4 sm:$0xff]  }
 0x1df   :  { %3162 = vmatprep.subr.mxu1 %v3696_v0 }
 0x1e1   :  { %3160 = vmatmul.mubr.f32.vlgmr.msra.gmra.mrb[4].mxu1 %v398_v14 }
 0x1e2   :  { %3163 = vmatpush3.xpose.msra.mxu1 %v405_v15  ;;  %3164 = vmatprep.mubr.msk.f32.mxu1 %vm3698_vm0, %v3696_v0 }
 0x1e3   :  { %3172 = vmatprep.subr.mxu1 %v3696_v0 }
 0x1e5   :  { %3165 = vmatmul.mubr.f32.vlgmr.msra.gmra.mrb[6].mxu1 %v399_v16  ;;  %v3375_v16 = vld [vmem:[#allocation6 + $0x14] ss:$8 sps:$4 sm:$0xff]  }
 0x1e6   :  { %3173 = vmatpush3.msra.mxu1 %v411_v17  ;;  %3174 = vmatprep.mubr.msk.f32.mxu1 %vm3698_vm0, %v3696_v0  ;;  %v3373_v17 = vld [vmem:[#allocation6 + $0x10] ss:$8 sps:$4 sm:$0xff]  }
 0x1e7   :  { %991 = vmatprep.subr.bf16.mxu1 %v3372_v3 }
 0x2b4   :  { %v490_v19 = vpop.f32.mrb[4].mxu1 }
 0x2b5   :  { %v491_v20 = vadd.f32 %v3971_v18, %v490_v19  ;;  %v3161_v21 = vpop.f32.mrb[5].mxu1  ;;  %v3378_v19 = vld [vmem:[#allocation6 + $0x24] ss:$8 sps:$4 sm:$0xff]  }
 0x2b6   :  { %v3381_v21 = vld [vmem:[#allocation6 + $0x34] ss:$8 sps:$4 sm:$0xff]  }
 0x2b7   :  { %v565_v23 = vsel %vm564_vm1, %v491_v20, -inf }
 0x2b8   :  { %566 = vmax.xlane.f32.xlu0 %v565_v23  ;;  %v560_v24 = vpop.f32.mrb[6].mxu1  ;;  %v3382_v23 = vld [vmem:[#allocation6 + $0x40] ss:$8 sps:$4 sm:$0xff]  }
 0x2b9   :  { %v561_v25 = vadd.f32 %v3977_v22, %v560_v24  ;;  %v3166_v27 = vpop.f32.mrb[7].mxu1  ;;  %v3387_v24 = vld [vmem:[#allocation6 + $0x54] ss:$8 sps:$4 sm:$0xff]  }
 0x2ba   :  { %v3390_v27 = vld [vmem:[#allocation6 + $0x64] ss:$8 sps:$4 sm:$0xff]  }
 0x2bb   :  { %v568_v28 = vsel %vm564_vm1, %v561_v25, -inf }
 0x2bc   :  { %569 = vmax.xlane.f32.xlu1 %v568_v28  ;;  %v3388_v28 = vld [vmem:[#allocation6 + $0x60] ss:$8 sps:$4 sm:$0xff]  }
 0x345   :  { %v567_v29 = vpop.xlane.xlu0 %566 }
 0x346   :  { %v571_v30 = vsub.f32 %v491_v20, %v567_v29  ;;  %v3376_v20 = vld [vmem:[#allocation6 + $0x20] ss:$8 sps:$4 sm:$0xff]   ;;  %v3393_v29 = vld [vmem:[#allocation6 + $0x74] ss:$8 sps:$4 sm:$0xff]  }
 0x348   :  { %v573_v31 = vmul.f32 1.442695, %v571_v30  ;;  %v3391_v30 = vld [vmem:[#allocation6 + $0x70] ss:$8 sps:$4 sm:$0xff]  }
 0x349   :  { %v570_v32 = vpop.xlane.xlu1 %569 }
 0x34a   :  { %3518 = vpow2.f32 %v573_v31  ;;  %v572_v33 = vsub.f32 %v561_v25, %v570_v32  ;;  %v3385_v25 = vld [vmem:[#allocation6 + $0x50] ss:$8 sps:$4 sm:$0xff]  }
 0x34c   :  { %v575_v34 = vmul.f32 1.442695, %v572_v33 }
 0x34e   :  { %3520 = vpow2.f32 %v575_v34 }
 0x354   :  { %v3519_v35 = vpop.eup %3518 }
 0x355   :  { %v577_v36 = vsel %vm564_vm1, %v3519_v35, 0.0 }
 0x356   :  { %578 = vadd.xlane.f32.xlu0 %v577_v36 }
 0x358   :  { %v3521_v37 = vpop.eup %3520 }
 0x359   :  { %v580_v38 = vsel %vm564_vm1, %v3521_v37, 0.0 }
 0x35a   :  { %581 = vadd.xlane.f32.xlu1 %v580_v38 }
 0x3e3   :  { %v579_v39 = vpop.xlane.xlu0 %578 }
 0x3e4   :  { %3522 = vrcp.f32 %v579_v39 }
 0x3e7   :  { %v582_v40 = vpop.xlane.xlu1 %581 }
 0x3e8   :  { %3524 = vrcp.f32 %v582_v40 }
 0x3ee   :  { %v3523_v41 = vpop.eup %3522 }
 0x3ef   :  { %v585_v43 = vmul.f32 %v3523_v41, %v3519_v35 }
 0x3f1   :  { %3170 = vmatmul.mubr.msk.f32.vlgmr.msra.gmra.mrb[4].mxu0 %vm564_vm1, %v585_v43 }
 0x3f2   :  { %v3525_v44 = vpop.eup %3524  ;;  %3178 = vmatpush3.bf16.msra.mxu0 %v3362_v42  ;;  %3193 = vmatprep.mubr.msk.bf16.mxu0 %vm3698_vm0, %v3696_v0 }
 0x3f3   :  { %v586_v48 = vmul.f32 %v3525_v44, %v3521_v37  ;;  %3179 = vmatprep.subr.bf16.mxu0 %v3696_v0 }
 0x3f5   :  { %3175 = vmatmul.mubr.msk.f32.vlgmr.msra.gmra.mrb[8].mxu1 %vm564_vm1, %v586_v48 }
 0x3f6   :  { %3180 = vmatpush3.bf16.msra.mxu0 %v3363_v47  ;;  %1023 = vmatprep.mubr.bf16.mxu1 %v3697_v26  ;;  %v4004_v47 = vsub.s32 4, %v3925_v45 }
 0x3f7   :  { %3181 = vmatprep.subr.bf16.mxu0 %v3696_v0  ;;  %992 = vmatpush1.bf16.msra.mxu1 %v3370_v2 }
 0x3f8   :  { %993 = vmatprep.subr.bf16.mxu1 %v3375_v16  ;;  %v3405_v16 = vld [vmem:[#allocation7 + $0x28] sm:$0xff]  }
 0x3fa   :  { %3182 = vmatpush3.bf16.msra.mxu0 %v3364_v49  ;;  %v874_v49 = vrot.slane %v3953_v63, %v4004_v47 }
 0x3fb   :  { %3183 = vmatprep.subr.bf16.mxu0 %v3696_v0  ;;  %994 = vmatpush1.bf16.msra.mxu1 %v3373_v17  ;;  %v3406_v17 = vld [vmem:[#allocation7 + $0x70] sm:$0xff]  }
 0x3fc   :  { %995 = vmatprep.subr.bf16.mxu1 %v3378_v19  ;;  %v3407_v19 = vld [vmem:[#allocation7 + $0x30] sm:$0xff]  }
 0x3fe   :  { %3184 = vmatpush3.bf16.msra.mxu0 %v3365_v50  ;;  %v4009_v50 = vsub.s32 5, %v3925_v45 }
 0x3ff   :  { %3185 = vmatprep.subr.bf16.mxu0 %v3696_v0  ;;  %996 = vmatpush1.bf16.msra.mxu1 %v3376_v20  ;;  %v3408_v20 = vld [vmem:[#allocation7 + $0x78] sm:$0xff]  }
 0x400   :  { %997 = vmatprep.subr.bf16.mxu1 %v3381_v21  ;;  %v3409_v21 = vld [vmem:[#allocation7 + $0x38] sm:$0xff]  }
 0x402   :  { %3186 = vmatpush3.bf16.msra.mxu0 %v3366_v51 }
 0x403   :  { %3187 = vmatprep.subr.bf16.mxu0 %v3696_v0 }
 0x406   :  { %3188 = vmatpush3.bf16.msra.mxu0 %v3367_v53 }
 0x407   :  { %3189 = vmatprep.subr.bf16.mxu0 %v3696_v0 }
 0x40a   :  { %3190 = vmatpush3.bf16.msra.mxu0 %v3368_v54 }
 0x40b   :  { %3191 = vmatprep.subr.bf16.mxu0 %v3696_v0 }
 0x40e   :  { %3192 = vmatpush3.bf16.msra.mxu0 %v3369_v55 }
 0x4c4   :  { %v656_v56 = vpop.f32.mrb[4].mxu0 }
 0x4c5   :  { %v3171_v57 = vpop.f32.mrb[5].mxu0 }
 0x4c8   :  { %v729_v58 = vpop.f32.mrb[8].mxu1 }
 0x4c9   :  { %v733_v61 = vpack.c.bf16 %v729_v58, %v656_v56  ;;  %v3176_v1 = vpop.f32.mrb[9].mxu1  ;;  %v880_v58 = vrot.slane %v3953_v63, %v4009_v50 }
 0x4cb   :  { %3194 = vmatmul.mubr.bf16.vlgmr.msra.gmra.mrb[8].mxu0 %v733_v61 }
 0x59e   :  { %v836_v6 = vpop.f32.mrb[8].mxu0 }
 0x59f   :  { %v837_v7 = vadd.f32 %v836_v6, %v753_v5  ;;  %v3195_v8 = vpop.f32.mrb[9].mxu0  ;;  %v3395_v6 = vld [vmem:[#allocation7] sm:$0xff]  }
 0x5a0   :  { %v839_v9 = vpop.f32.mrb[10].mxu0  ;;  %v3397_v8 = vld [vmem:[#allocation7 + $0x8] sm:$0xff]  }
 0x5a1   :  { %v843_v10 = vadd.f32 %v837_v7, %v3937_v59  ;;  %v840_v11 = vadd.f32 %v839_v9, %v753_v5  ;;  %v3196_v12 = vpop.f32.mrb[11].mxu0  ;;  %v3379_v59 = vld [vmem:[#allocation6 + $0x30] ss:$8 sps:$4 sm:$0xff]   ;;  %v3394_v5 = vld [vmem:[#allocation7 + $0x40] sm:$0xff]   ;;  %v3396_v7 = vld [vmem:[#allocation7 + $0x48] sm:$0xff]  }
 0x5a2   :  { %998 = vmatpush1.bf16.msra.mxu1 %v3379_v59  ;;  %3040 = vmatprep.subr.bf16.mxu0 %v3394_v5  ;;  %v3398_v9 = vld [vmem:[#allocation7 + $0x50] sm:$0xff]   ;;  %v3401_v12 = vld [vmem:[#allocation7 + $0x18] sm:$0xff]  }
 0x5a3   :  { %v844_v13 = vadd.f32 %v840_v11, %v3939_v60  ;;  %845 = vadd.xlane.f32.xlu0 %v843_v10  ;;  %v851_v14 = vmul.f32 %v843_v10, %v843_v10  ;;  %v3384_v60 = vld [vmem:[#allocation6 + $0x44] ss:$8 sps:$4 sm:$0xff]   ;;  %3041 = vmatpush3.bf16.msra.mxu0 %v3395_v6  ;;  %v3400_v11 = vld [vmem:[#allocation7 + $0x58] sm:$0xff]  }
 0x5a4   :  { %999 = vmatprep.subr.bf16.mxu1 %v3384_v60  ;;  %3042 = vmatprep.subr.bf16.mxu0 %v3396_v7  ;;  %v148_v59 = vld [vmem:[%s4263_s4] sm:$0x3] }
 0x5a5   :  { %847 = vadd.xlane.f32.xlu1 %v844_v13  ;;  %v852_v15 = vmul.f32 %v844_v13, %v844_v13  ;;  %v908_v60 = vrot.slane %v148_v59, %v3933_v52 }
 0x5a6   :  { %1000 = vmatpush1.bf16.msra.mxu1 %v3382_v23  ;;  %v904_v23 = vrot.slane %v148_v59, %v3928_v46  ;;  %v3412_v59 = vld [vmem:[%s4264_s5 + $0xc4] ss:$12 sps:$4 sm:$0xff]  }
 0x5a7   :  { %853 = vadd.xlane.f32.xlu0 %v851_v14  ;;  %1001 = vmatprep.subr.bf16.mxu1 %v3387_v24  ;;  %v3403_v14 = vld [vmem:[#allocation7 + $0x20] sm:$0xff]  }
 0x5a8   :  { %3043 = vmatpush3.bf16.msra.mxu0 %v3397_v8 }
 0x5a9   :  { %855 = vadd.xlane.f32.xlu1 %v852_v15  ;;  %3044 = vmatprep.subr.bf16.mxu0 %v3398_v9  ;;  %v3404_v15 = vld [vmem:[#allocation7 + $0x68] sm:$0xff]  }
 0x5aa   :  { %1002 = vmatpush1.bf16.msra.mxu1 %v3385_v25 }
 0x5ab   :  { %1003 = vmatprep.subr.bf16.mxu1 %v3390_v27 }
 0x5ae   :  { %1004 = vmatpush1.bf16.msra.mxu1 %v3388_v28 }
 0x5af   :  { %1005 = vmatprep.subr.bf16.mxu1 %v3393_v29 }
 0x5b2   :  { %1006 = vmatpush1.bf16.msra.mxu1 %v3391_v30 }
 0x5b3   :  { %1452 = vmatprep.subr.bf16.mxu1 %v3412_v59 }
 0x630   :  { %v846_v31 = vpop.xlane.xlu0 %845 }
 0x631   :  { %v849_v32 = vmul.f32 0.0078125, %v846_v31 }
 0x632   :  { %v848_v33 = vpop.xlane.xlu1 %847 }
 0x633   :  { %v850_v34 = vmul.f32 0.0078125, %v848_v33  ;;  %v859_v36 = vmul.f32 %v849_v32, %v849_v32  ;;  %v863_v48 = vsub.f32 %v843_v10, %v849_v32  ;;  %v3399_v10 = vld [vmem:[#allocation7 + $0x10] sm:$0xff]  }
 0x634   :  { %v854_v35 = vpop.xlane.xlu0 %853  ;;  %3045 = vmatpush3.bf16.msra.mxu0 %v3399_v10 }
 0x635   :  { %v857_v37 = vmul.f32 0.0078125, %v854_v35  ;;  %v860_v39 = vmul.f32 %v850_v34, %v850_v34  ;;  %v864_v53 = vsub.f32 %v844_v13, %v850_v34  ;;  %3046 = vmatprep.subr.bf16.mxu0 %v3400_v11  ;;  %v3402_v13 = vld [vmem:[#allocation7 + $0x60] sm:$0xff]  }
 0x636   :  { %v856_v38 = vpop.xlane.xlu1 %855 }
 0x637   :  { %v861_v40 = vsub.f32 %v857_v37, %v859_v36  ;;  %v858_v41 = vmul.f32 0.0078125, %v856_v38 }
 0x638   :  { %3047 = vmatpush3.bf16.msra.mxu0 %v3401_v12 }
 0x639   :  { %v865_v42 = vadd.f32 1e-05, %v861_v40  ;;  %v862_v43 = vsub.f32 %v858_v41, %v860_v39  ;;  %3048 = vmatprep.subr.bf16.mxu0 %v3402_v13 }
 0x63b   :  { %3526 = vrsqrt.f32 %v865_v42  ;;  %v866_v44 = vadd.f32 1e-05, %v862_v43 }
 0x63c   :  { %3049 = vmatpush3.bf16.msra.mxu0 %v3403_v14 }
 0x63d   :  { %3528 = vrsqrt.f32 %v866_v44  ;;  %3050 = vmatprep.subr.bf16.mxu0 %v3404_v15 }
 0x640   :  { %3051 = vmatpush3.bf16.msra.mxu0 %v3405_v16 }
 0x641   :  { %3052 = vmatprep.subr.bf16.mxu0 %v3406_v17 }
 0x644   :  { %3053 = vmatpush3.bf16.msra.mxu0 %v3407_v19 }
 0x645   :  { %v3527_v51 = vpop.eup %3526  ;;  %3054 = vmatprep.subr.bf16.mxu0 %v3408_v20 }
 0x646   :  { %v869_v54 = vmul.f32 %v3527_v51, %v863_v48 }
 0x647   :  { %v3529_v55 = vpop.eup %3528 }
 0x648   :  { %v870_v56 = vmul.f32 %v3529_v55, %v864_v53  ;;  %v875_v57 = vmul.f32 %v874_v49, %v869_v54  ;;  %3055 = vmatpush3.bf16.msra.mxu0 %v3409_v21  ;;  %v3410_v21 = vld [vmem:[%s4264_s5 + $0xc0] ss:$12 sps:$4 sm:$0xff]  }
 0x649   :  { %3197 = vmatprep.subr.bf16.mxu0 %v3696_v0 }
 0x64a   :  { %v876_v61 = vmul.f32 %v874_v49, %v870_v56  ;;  %v4013_v1 = vadd.f32 %v880_v58, %v875_v57 }
 0x64c   :  { %v4015_v2 = vadd.f32 %v880_v58, %v876_v61 }
 0x64e   :  { %v883_v3 = vpack.c.bf16 %v4015_v2, %v4013_v1 }
 0x650   :  { %1024 = vmatmul.mubr.bf16.vlgmr.msra.gmra.mrb[12].mxu1 %v883_v3 }
 0x651   :  { %1484 = vmatprep.mubr.bf16.mxu1 %v3697_v26  ;;  %1453 = vmatpush1.bf16.msra.mxu1 %v3410_v21  ;;  %v1275_v21 = vsub.s32 7, %v3925_v45 }
 0x723   :  { %v1025_v24 = vpop.f32.mrb[12].mxu1 }
 0x724   :  { %v1026_v25 = vadd.f32 %v1025_v24, %v904_v23  ;;  %v1027_v27 = vpop.f32.mrb[13].mxu1 }
 0x725   :  { %v1028_v28 = vadd.f32 %v1027_v27, %v908_v60  ;;  %v1029_v29 = vpop.f32.mrb[14].mxu1 }
 0x726   :  { %v1034_v30 = vmul.f32 %v1026_v25, %v1026_v25  ;;  %v1030_v31 = vadd.f32 %v1029_v29, %v904_v23  ;;  %v1031_v32 = vpop.f32.mrb[15].mxu1  ;;  %v4035_v23 = vsub.s32 6, %v3925_v45 }
 0x727   :  { %v1035_v33 = vmul.f32 %v1028_v28, %v1028_v28  ;;  %v1032_v34 = vadd.f32 %v1031_v32, %v908_v60 }
 0x728   :  { %v1038_v35 = vmul.f32 %v1034_v30, %v1026_v25  ;;  %v1036_v36 = vmul.f32 %v1030_v31, %v1030_v31  ;;  %v1107_v24 = vrot.slane %v3953_v63, %v4035_v23 }
 0x729   :  { %v1039_v37 = vmul.f32 %v1035_v33, %v1028_v28  ;;  %v1037_v38 = vmul.f32 %v1032_v34, %v1032_v34 }
 0x72a   :  { %v1042_v39 = vmul.f32 0.044715, %v1038_v35  ;;  %v1040_v40 = vmul.f32 %v1036_v36, %v1030_v31 }
 0x72b   :  { %v1043_v41 = vmul.f32 0.044715, %v1039_v37  ;;  %v1041_v42 = vmul.f32 %v1037_v38, %v1032_v34  ;;  %v3414_v37 = vld [vmem:[%s4264_s5 + $0xd8] ss:$12 sps:$4 sm:$0xff]   ;;  %v3417_v38 = vld [vmem:[%s4264_s5 + $0xe0] ss:$12 sps:$4 sm:$0xff]  }
 0x72c   :  { %v1046_v43 = vadd.f32 %v1042_v39, %v1026_v25  ;;  %v1044_v44 = vmul.f32 0.044715, %v1040_v40  ;;  %v3420_v39 = vld [vmem:[%s4264_s5 + $0xf4] ss:$12 sps:$4 sm:$0xff]   ;;  %v3418_v40 = vld [vmem:[%s4264_s5 + $0xf0] ss:$12 sps:$4 sm:$0xff]  }
 0x72d   :  { %v1047_v48 = vadd.f32 %v1043_v41, %v1028_v28  ;;  %v1045_v49 = vmul.f32 0.044715, %v1041_v42  ;;  %v3421_v41 = vld [vmem:[%s4264_s5 + $0xf8] ss:$12 sps:$4 sm:$0xff]  }
 0x72e   :  { %v1050_v51 = vmul.f32 0.7978846, %v1046_v43  ;;  %v1048_v53 = vadd.f32 %v1044_v44, %v1030_v31  ;;  %v3424_v42 = vld [vmem:[%s4264_s5 + $0x10c] ss:$12 sps:$4 sm:$0xff]   ;;  %v3422_v43 = vld [vmem:[%s4264_s5 + $0x108] ss:$12 sps:$4 sm:$0xff]  }
 0x72f   :  { %v1051_v54 = vmul.f32 0.7978846, %v1047_v48  ;;  %v1049_v55 = vadd.f32 %v1045_v49, %v1032_v34  ;;  %v3425_v44 = vld [vmem:[%s4264_s5 + $0x110] ss:$12 sps:$4 sm:$0xff]   ;;  %v3426_v48 = vld [vmem:[%s4264_s5 + $0x120] ss:$12 sps:$4 sm:$0xff]  }
 0x730   :  { %3530 = vtanh.f32 %v1050_v51  ;;  %v1052_v56 = vmul.f32 0.7978846, %v1048_v53  ;;  %v3428_v49 = vld [vmem:[%s4264_s5 + $0x124] ss:$12 sps:$4 sm:$0xff]   ;;  %v3429_v51 = vld [vmem:[%s4264_s5 + $0x128] ss:$12 sps:$4 sm:$0xff]  }
 0x731   :  { %3532 = vtanh.f32 %v1051_v54  ;;  %v1053_v57 = vmul.f32 0.7978846, %v1049_v55  ;;  %v3432_v53 = vld [vmem:[%s4264_s5 + $0x13c] ss:$12 sps:$4 sm:$0xff]   ;;  %v3430_v54 = vld [vmem:[%s4264_s5 + $0x138] ss:$12 sps:$4 sm:$0xff]  }
 0x732   :  { %3534 = vtanh.f32 %v1052_v56  ;;  %v3433_v55 = vld [vmem:[%s4264_s5 + $0x140] ss:$12 sps:$4 sm:$0xff]  }
 0x733   :  { %3536 = vtanh.f32 %v1053_v57  ;;  %v3436_v56 = vld [vmem:[%s4264_s5 + $0x154] ss:$12 sps:$4 sm:$0xff]   ;;  %v3434_v57 = vld [vmem:[%s4264_s5 + $0x150] ss:$12 sps:$4 sm:$0xff]  }
 0x73a   :  { %v3531_v58 = vpop.eup %3530 }
 0x73b   :  { %v3533_v61 = vpop.eup %3532  ;;  %v1058_v3 = vadd.f32 1.0, %v3531_v58  ;;  %v3437_v58 = vld [vmem:[%s4264_s5 + $0x158] ss:$12 sps:$4 sm:$0xff]  }
 0x73c   :  { %v3535_v5 = vpop.eup %3534  ;;  %v1059_v6 = vadd.f32 1.0, %v3533_v61  ;;  %v3440_v61 = vld [vmem:[%s4264_s5 + $0x16c] ss:$12 sps:$4 sm:$0xff]  }
 0x73d   :  { %v3537_v7 = vpop.eup %3536  ;;  %v1062_v8 = vmul.f32 0.5, %v1058_v3  ;;  %v1060_v9 = vadd.f32 1.0, %v3535_v5  ;;  %v3438_v3 = vld [vmem:[%s4264_s5 + $0x168] ss:$12 sps:$4 sm:$0xff]   ;;  %v3441_v5 = vld [vmem:[%s4264_s5 + $0x170] ss:$12 sps:$4 sm:$0xff]  }
 0x73e   :  { %v1061_v10 = vadd.f32 1.0, %v3537_v7  ;;  %v1063_v11 = vmul.f32 0.5, %v1059_v6 }
 0x73f   :  { %v1064_v12 = vmul.f32 0.5, %v1060_v9  ;;  %v1066_v14 = vmul.f32 %v1062_v8, %v1026_v25 }
 0x740   :  { %v1065_v13 = vmul.f32 0.5, %v1061_v10  ;;  %v1067_v16 = vmul.f32 %v1063_v11, %v1028_v28 }
 0x741   :  { %v1068_v15 = vmul.f32 %v1064_v12, %v1030_v31 }
 0x742   :  { %v1069_v17 = vmul.f32 %v1065_v13, %v1032_v34 }
 0x743   :  { %v1070_v19 = vpack.c.bf16 %v1068_v15, %v1066_v14 }
 0x744   :  { %v1071_v20 = vpack.c.bf16 %v1069_v17, %v1067_v16 }
 0x746   :  { %1236 = vmatprep.mubr.bf16.mxu0 %v1071_v20 }
 0x747   :  { %1237 = vmatmul.mubr.bf16.vlgmr.msra.gmra.mrb[12].mxu0 %v1070_v19 }
 0x748   :  { %3213 = vmatprep.mubr.msk.bf16.mxu0 %vm3698_vm0, %v3696_v0 }
 0x81a   :  { %v3056_v60 = vpop.f32.mrb[12].mxu0 }
 0x81b   :  { %v3057_v25 = vpop.f32.mrb[13].mxu0 }
 0x81c   :  { %v3058_v27 = vadd.f32 %v3057_v25, %v3056_v60  ;;  %v3059_v28 = vpop.f32.mrb[14].mxu0  ;;  %v1276_v60 = vrot.slane %v3953_v63, %v1275_v21  ;;  %v4146_v63 = vld [vmem:[%s4262_s3 + $0x10] sm:$0xff] }
 0x81d   :  { %v3060_v29 = vpop.f32.mrb[15].mxu0 }
 0x81e   :  { %v1239_v30 = vadd.f32 %v3058_v27, %v1107_v24  ;;  %v3061_v31 = vadd.f32 %v3060_v29, %v3059_v28 }
 0x820   :  { %v1242_v32 = vadd.f32 %v3061_v31, %v1107_v24  ;;  %v4040_v33 = vadd.f32 %v1239_v30, %v4013_v1  ;;  %v3413_v1 = vld [vmem:[%s4264_s5 + $0xc8] ss:$12 sps:$4 sm:$0xff]  }
 0x821   :  { %3198 = vmatpush3.bf16.msra.mxu0 %v3413_v1  ;;  %v2885_v31 = vld [vmem:[%s4262_s3 + $0x8] ss:$0 sm:$0xff] }
 0x822   :  { %1247 = vadd.xlane.f32.xlu0 %v4040_v33  ;;  %v4044_v34 = vadd.f32 %v1242_v32, %v4015_v2  ;;  %v1253_v35 = vmul.f32 %v4040_v33, %v4040_v33  ;;  %v3416_v2 = vld [vmem:[%s4264_s5 + $0xdc] ss:$12 sps:$4 sm:$0xff]   ;;  %3199 = vmatprep.subr.bf16.mxu0 %v3696_v0 }
 0x823   :  { %1454 = vmatprep.subr.bf16.mxu1 %v3416_v2 }
 0x824   :  { %1249 = vadd.xlane.f32.xlu1 %v4044_v34  ;;  %v1254_v36 = vmul.f32 %v4044_v34, %v4044_v34  ;;  %1455 = vmatpush1.bf16.msra.mxu1 %v3414_v37  ;;  %v1539_v37 = vrot.slane %v4146_v63, %v3928_v46 }
 0x825   :  { %3200 = vmatpush3.bf16.msra.mxu0 %v3417_v38  ;;  %1456 = vmatprep.subr.bf16.mxu1 %v3420_v39  ;;  %v1551_v38 = vrot.slane %v4146_v63, %v3948_v62 }
 0x826   :  { %1255 = vadd.xlane.f32.xlu0 %v1253_v35  ;;  %3201 = vmatprep.subr.bf16.mxu0 %v3696_v0 }
 0x828   :  { %1257 = vadd.xlane.f32.xlu1 %v1254_v36  ;;  %1457 = vmatpush1.bf16.msra.mxu1 %v3418_v40 }
 0x829   :  { %3202 = vmatpush3.bf16.msra.mxu0 %v3421_v41  ;;  %1458 = vmatprep.subr.bf16.mxu1 %v3424_v42 }
 0x82a   :  { %3203 = vmatprep.subr.bf16.mxu0 %v3696_v0 }
 0x82c   :  { %1459 = vmatpush1.bf16.msra.mxu1 %v3422_v43 }
 0x82d   :  { %3204 = vmatpush3.bf16.msra.mxu0 %v3425_v44  ;;  %1460 = vmatprep.subr.bf16.mxu1 %v3428_v49 }
 0x82e   :  { %3205 = vmatprep.subr.bf16.mxu0 %v3696_v0 }
 0x830   :  { %1461 = vmatpush1.bf16.msra.mxu1 %v3426_v48 }
 0x831   :  { %3206 = vmatpush3.bf16.msra.mxu0 %v3429_v51  ;;  %1462 = vmatprep.subr.bf16.mxu1 %v3432_v53 }
 0x832   :  { %3207 = vmatprep.subr.bf16.mxu0 %v3696_v0 }
 0x834   :  { %1463 = vmatpush1.bf16.msra.mxu1 %v3430_v54 }
 0x835   :  { %3208 = vmatpush3.bf16.msra.mxu0 %v3433_v55  ;;  %1464 = vmatprep.subr.bf16.mxu1 %v3436_v56 }
 0x836   :  { %3209 = vmatprep.subr.bf16.mxu0 %v3696_v0 }
 0x838   :  { %1465 = vmatpush1.bf16.msra.mxu1 %v3434_v57 }
 0x839   :  { %3210 = vmatpush3.bf16.msra.mxu0 %v3437_v58  ;;  %1466 = vmatprep.subr.bf16.mxu1 %v3440_v61 }
 0x83a   :  { %3211 = vmatprep.subr.bf16.mxu0 %v3696_v0 }
 0x83c   :  { %1467 = vmatpush1.bf16.msra.mxu1 %v3438_v3 }
 0x83d   :  { %3212 = vmatpush3.bf16.msra.mxu0 %v3441_v5  ;;  %3217 = vmatprep.subr.mxu1 %v3696_v0 }
 0x8af   :  { %v1248_v6 = vpop.xlane.xlu0 %1247 }
 0x8b0   :  { %v1251_v7 = vmul.f32 0.0078125, %v1248_v6 }
 0x8b1   :  { %v1250_v8 = vpop.xlane.xlu1 %1249 }
 0x8b2   :  { %v1252_v9 = vmul.f32 0.0078125, %v1250_v8  ;;  %v1261_v11 = vmul.f32 %v1251_v7, %v1251_v7  ;;  %v1265_v59 = vsub.f32 %v4040_v33, %v1251_v7 }
 0x8b3   :  { %v1256_v10 = vpop.xlane.xlu0 %1255 }
 0x8b4   :  { %v1259_v12 = vmul.f32 0.0078125, %v1256_v10  ;;  %v1262_v14 = vmul.f32 %v1252_v9, %v1252_v9  ;;  %v1266_v25 = vsub.f32 %v4044_v34, %v1252_v9  ;;  %v1545_v34 = vrot.slane %v4146_v63, %v3933_v52 }
 0x8b5   :  { %v1258_v13 = vpop.xlane.xlu1 %1257 }
 0x8b6   :  { %v1263_v15 = vsub.f32 %v1259_v12, %v1261_v11  ;;  %v1260_v16 = vmul.f32 0.0078125, %v1258_v13 }
 0x8b8   :  { %v1267_v17 = vadd.f32 1e-05, %v1263_v15  ;;  %v1264_v19 = vsub.f32 %v1260_v16, %v1262_v14 }
 0x8ba   :  { %3538 = vrsqrt.f32 %v1267_v17  ;;  %v1268_v20 = vadd.f32 1e-05, %v1264_v19 }
 0x8bc   :  { %3540 = vrsqrt.f32 %v1268_v20 }
 0x8c4   :  { %v3539_v24 = vpop.eup %3538 }
 0x8c5   :  { %v1271_v27 = vmul.f32 %v3539_v24, %v1265_v59  ;;  %v3442_v59 = vld [vmem:[#allocation4 + $0x40] sm:$0xff]   ;;  %v3443_v24 = vld [vmem:[#allocation4 + $0x48] sm:$0xff]  }
 0x8c6   :  { %v3541_v28 = vpop.eup %3540 }
 0x8c7   :  { %v1272_v29 = vmul.f32 %v3541_v28, %v1266_v25  ;;  %v1277_v30 = vmul.f32 %v1276_v60, %v1271_v27  ;;  %v3444_v25 = vld [vmem:[#allocation4 + $0x50] sm:$0xff]   ;;  %v3445_v27 = vld [vmem:[#allocation4 + $0x58] sm:$0xff]   ;;  %v3446_v28 = vld [vmem:[#allocation4 + $0x60] sm:$0xff]  }
 0x8c9   :  { %v1278_v32 = vmul.f32 %v1276_v60, %v1272_v29  ;;  %v4134_v35 = vadd.f32 %v2885_v31, %v1277_v30  ;;  %v3447_v29 = vld [vmem:[#allocation4 + $0x68] sm:$0xff]   ;;  %v3448_v30 = vld [vmem:[#allocation4 + $0x70] sm:$0xff]  }
 0x8cb   :  { %v4136_v36 = vadd.f32 %v2885_v31, %v1278_v32  ;;  %v3449_v31 = vld [vmem:[#allocation4 + $0x78] sm:$0xff]  }
 0x8cd   :  { %v1290_v33 = vpack.c.bf16 %v4136_v36, %v4134_v35 }
 0x8cf   :  { %1485 = vmatmul.mubr.bf16.vlgmr.msra.gmra.mrb[16].mxu1 %v1290_v33  ;;  %3214 = vmatmul.mubr.bf16.vlgmr.msra.gmra.mrb[16].mxu0 %v1290_v33 }
 0x8d0   :  { %3219 = vmatprep.mubr.msk.f32.mxu1 %vm3698_vm0, %v3696_v0  ;;  %2154 = vmatprep.mubr.bf16.mxu0 %v3697_v26 }
 0x9a2   :  { %v1486_v1 = vpop.f32.mrb[16].mxu1  ;;  %v1529_v2 = vpop.f32.mrb[16].mxu0 }
 0x9a3   :  { %v1488_v39 = vpop.f32.mrb[17].mxu1  ;;  %v3215_v40 = vpop.f32.mrb[17].mxu0  ;;  %v1540_v49 = vadd.f32 %v1539_v37, %v1486_v1  ;;  %v1552_v54 = vadd.f32 %v1551_v38, %v1529_v2 }
 0x9a4   :  { %v1546_v41 = vadd.f32 %v1545_v34, %v1488_v39  ;;  %v1490_v26 = vpop.f32.mrb[18].mxu1  ;;  %v1532_v42 = vpop.f32.mrb[18].mxu0  ;;  %v1883_v39 = vrot.slane %v4146_v63, %v3997_v4 }
 0x9a5   :  { %v1553_v43 = vadd.f32 %v1551_v38, %v1532_v42  ;;  %v1492_v44 = vpop.f32.mrb[19].mxu1  ;;  %v3216_v48 = vpop.f32.mrb[19].mxu0  ;;  %v1541_v53 = vadd.f32 %v1539_v37, %v1490_v26  ;;  %v3450_v37 = vld [vmem:[#allocation6 + $0x80] ss:$8 sps:$4 sm:$0xff]   ;;  %v3452_v38 = vld [vmem:[#allocation6 + $0x84] ss:$8 sps:$4 sm:$0xff]  }
 0x9a6   :  { %3218 = vmatpush3.xpose.msra.mxu1 %v1546_v41  ;;  %v1547_v51 = vadd.f32 %v1545_v34, %v1492_v44  ;;  %2122 = vmatprep.subr.bf16.mxu0 %v3452_v38  ;;  %v3474_v38 = vld [vmem:[#allocation7 + $0xc0] sm:$0xff]  }
 0x9a7   :  { %3222 = vmatprep.subr.mxu1 %v3696_v0  ;;  %2123 = vmatpush1.bf16.msra.mxu0 %v3450_v37 }
 0x9a9   :  { %3220 = vmatmul.mubr.f32.vlgmr.msra.gmra.mrb[10].mxu1 %v1540_v49 }
 0x9aa   :  { %3223 = vmatpush3.xpose.msra.mxu1 %v1547_v51  ;;  %3224 = vmatprep.mubr.msk.f32.mxu1 %vm3698_vm0, %v3696_v0 }
 0x9ab   :  { %3227 = vmatprep.subr.mxu1 %v3696_v0 }
 0x9ad   :  { %3225 = vmatmul.mubr.f32.vlgmr.msra.gmra.mrb[20].mxu1 %v1541_v53 }
 0x9ae   :  { %3228 = vmatpush3.msra.mxu1 %v1552_v54  ;;  %3229 = vmatprep.mubr.msk.f32.mxu1 %vm3698_vm0, %v3696_v0  ;;  %v3455_v54 = vld [vmem:[#allocation6 + $0x94] ss:$8 sps:$4 sm:$0xff]  }
 0x9af   :  { %3232 = vmatprep.subr.mxu1 %v3696_v0  ;;  %2124 = vmatprep.subr.bf16.mxu0 %v3455_v54  ;;  %v3486_v54 = vld [vmem:[#allocation7 + $0xf0] sm:$0xff]  }
 0xa7c   :  { %v1620_v55 = vpop.f32.mrb[10].mxu1 }
 0xa7d   :  { %v1621_v56 = vadd.f32 %v3971_v18, %v1620_v55  ;;  %v3221_v57 = vpop.f32.mrb[11].mxu1  ;;  %v3453_v55 = vld [vmem:[#allocation6 + $0x90] ss:$8 sps:$4 sm:$0xff]  }
 0xa7e   :  { %2125 = vmatpush1.bf16.msra.mxu0 %v3453_v55  ;;  %v3456_v57 = vld [vmem:[#allocation6 + $0xa0] ss:$8 sps:$4 sm:$0xff]   ;;  %v3487_v55 = vld [vmem:[#allocation7 + $0xb0] sm:$0xff]  }
 0xa7f   :  { %v1694_v58 = vsel %vm564_vm1, %v1621_v56, -inf }
 0xa80   :  { %1695 = vmax.xlane.f32.xlu0 %v1694_v58  ;;  %v1690_v61 = vpop.f32.mrb[20].mxu1  ;;  %v3461_v58 = vld [vmem:[#allocation6 + $0xb4] ss:$8 sps:$4 sm:$0xff]  }
 0xa81   :  { %v1691_v3 = vadd.f32 %v3977_v22, %v1690_v61  ;;  %v3226_v5 = vpop.f32.mrb[21].mxu1  ;;  %v3464_v61 = vld [vmem:[#allocation6 + $0xc4] ss:$8 sps:$4 sm:$0xff]  }
 0xa82   :  { %v3465_v5 = vld [vmem:[#allocation6 + $0xd0] ss:$8 sps:$4 sm:$0xff]  }
 0xa83   :  { %v1697_v6 = vsel %vm564_vm1, %v1691_v3, -inf }
 0xa84   :  { %1698 = vmax.xlane.f32.xlu1 %v1697_v6  ;;  %v3470_v6 = vld [vmem:[#allocation6 + $0xe4] ss:$8 sps:$4 sm:$0xff]  }
 0xb0d   :  { %v1696_v7 = vpop.xlane.xlu0 %1695 }
 0xb0e   :  { %v1700_v8 = vsub.f32 %v1621_v56, %v1696_v7  ;;  %v3458_v56 = vld [vmem:[#allocation6 + $0xa4] ss:$8 sps:$4 sm:$0xff]   ;;  %v3468_v7 = vld [vmem:[#allocation6 + $0xe0] ss:$8 sps:$4 sm:$0xff]  }
 0xb0f   :  { %2126 = vmatprep.subr.bf16.mxu0 %v3458_v56  ;;  %v3488_v56 = vld [vmem:[#allocation7 + $0xf8] sm:$0xff]  }
 0xb10   :  { %v1702_v9 = vmul.f32 1.442695, %v1700_v8  ;;  %2127 = vmatpush1.bf16.msra.mxu0 %v3456_v57  ;;  %v3473_v8 = vld [vmem:[#allocation6 + $0xf4] ss:$8 sps:$4 sm:$0xff]  }
 0xb11   :  { %v1699_v10 = vpop.xlane.xlu1 %1698  ;;  %2128 = vmatprep.subr.bf16.mxu0 %v3461_v58  ;;  %v3489_v57 = vld [vmem:[#allocation7 + $0xb8] sm:$0xff]  }
 0xb12   :  { %3542 = vpow2.f32 %v1702_v9  ;;  %v1701_v11 = vsub.f32 %v1691_v3, %v1699_v10  ;;  %v3467_v3 = vld [vmem:[#allocation6 + $0xd4] ss:$8 sps:$4 sm:$0xff]   ;;  %v3471_v9 = vld [vmem:[#allocation6 + $0xf0] ss:$8 sps:$4 sm:$0xff]  }
 0xb13   :  { %v2888_v58 = vld [vmem:[%s4263_s4 + $0x2] sm:$0x3] }
 0xb14   :  { %v1704_v12 = vmul.f32 1.442695, %v1701_v11 }
 0xb16   :  { %3544 = vpow2.f32 %v1704_v12 }
 0xb1c   :  { %v3543_v18 = vpop.eup %3542 }
 0xb1d   :  { %v1706_v13 = vsel %vm564_vm1, %v3543_v18, 0.0 }
 0xb1e   :  { %1707 = vadd.xlane.f32.xlu0 %v1706_v13 }
 0xb20   :  { %v3545_v14 = vpop.eup %3544 }
 0xb21   :  { %v1709_v15 = vsel %vm564_vm1, %v3545_v14, 0.0 }
 0xb22   :  { %1710 = vadd.xlane.f32.xlu1 %v1709_v15 }
 0xbab   :  { %v1708_v22 = vpop.xlane.xlu0 %1707 }
 0xbac   :  { %3546 = vrcp.f32 %v1708_v22 }
 0xbaf   :  { %v1711_v16 = vpop.xlane.xlu1 %1710 }
 0xbb0   :  { %3548 = vrcp.f32 %v1711_v16 }
 0xbb6   :  { %v3547_v17 = vpop.eup %3546 }
 0xbb7   :  { %v1714_v19 = vmul.f32 %v3547_v17, %v3543_v18 }
 0xbb9   :  { %3230 = vmatmul.mubr.msk.f32.vlgmr.msra.gmra.mrb[22].mxu1 %vm564_vm1, %v1714_v19 }
 0xbba   :  { %v3549_v20 = vpop.eup %3548  ;;  %3233 = vmatpush3.msra.mxu1 %v1553_v43  ;;  %3234 = vmatprep.mubr.msk.f32.mxu1 %vm3698_vm0, %v3696_v0 }
 0xbbb   :  { %v1715_v60 = vmul.f32 %v3549_v20, %v3545_v14  ;;  %3237 = vmatprep.subr.bf16.mxu1 %v3696_v0 }
 0xbbd   :  { %3235 = vmatmul.mubr.msk.f32.vlgmr.msra.gmra.mrb[24].mxu1 %vm564_vm1, %v1715_v60 }
 0xbbe   :  { %3238 = vmatpush3.bf16.msra.mxu1 %v3442_v59  ;;  %3253 = vmatprep.mubr.msk.bf16.mxu1 %vm3698_vm0, %v3696_v0 }
 0xbbf   :  { %3239 = vmatprep.subr.bf16.mxu1 %v3696_v0 }
 0xbc2   :  { %3240 = vmatpush3.bf16.msra.mxu1 %v3443_v24 }
 0xbc3   :  { %3241 = vmatprep.subr.bf16.mxu1 %v3696_v0 }
 0xbc6   :  { %3242 = vmatpush3.bf16.msra.mxu1 %v3444_v25  ;;  %v2004_v25 = vrot.slane %v4146_v63, %v4004_v47 }
 0xbc7   :  { %3243 = vmatprep.subr.bf16.mxu1 %v3696_v0 }
 0xbca   :  { %3244 = vmatpush3.bf16.msra.mxu1 %v3445_v27 }
 0xbcb   :  { %3245 = vmatprep.subr.bf16.mxu1 %v3696_v0 }
 0xbce   :  { %3246 = vmatpush3.bf16.msra.mxu1 %v3446_v28 }
 0xbcf   :  { %3247 = vmatprep.subr.bf16.mxu1 %v3696_v0 }
 0xbd2   :  { %3248 = vmatpush3.bf16.msra.mxu1 %v3447_v29 }
 0xbd3   :  { %3249 = vmatprep.subr.bf16.mxu1 %v3696_v0 }
 0xbd6   :  { %3250 = vmatpush3.bf16.msra.mxu1 %v3448_v30 }
 0xbd7   :  { %3251 = vmatprep.subr.bf16.mxu1 %v3696_v0 }
 0xbda   :  { %3252 = vmatpush3.bf16.msra.mxu1 %v3449_v31 }
 0xbdb   :  { %3088 = vmatprep.subr.bf16.mxu1 %v3474_v38 }
 0xc8c   :  { %v1785_v32 = vpop.f32.mrb[22].mxu1 }
 0xc8d   :  { %v3231_v33 = vpop.f32.mrb[23].mxu1 }
 0xc8e   :  { %v2010_v33 = vrot.slane %v4146_v63, %v4009_v50 }
 0xc90   :  { %v1858_v34 = vpop.f32.mrb[24].mxu1 }
 0xc91   :  { %v1862_v1 = vpack.c.bf16 %v1858_v34, %v1785_v32  ;;  %v3236_v2 = vpop.f32.mrb[25].mxu1 }
 0xc93   :  { %3254 = vmatmul.mubr.bf16.vlgmr.msra.gmra.mrb[28].mxu1 %v1862_v1 }
 0xd66   :  { %v1966_v40 = vpop.f32.mrb[28].mxu1 }
 0xd67   :  { %v1967_v41 = vadd.f32 %v1966_v40, %v1883_v39  ;;  %v3255_v26 = vpop.f32.mrb[29].mxu1  ;;  %v3476_v40 = vld [vmem:[#allocation7 + $0xc8] sm:$0xff]  }
 0xd68   :  { %v1969_v42 = vpop.f32.mrb[30].mxu1  ;;  %v3478_v26 = vld [vmem:[#allocation7 + $0xd0] sm:$0xff]  }
 0xd69   :  { %v1973_v43 = vadd.f32 %v1967_v41, %v4134_v35  ;;  %v1970_v44 = vadd.f32 %v1969_v42, %v1883_v39  ;;  %v3256_v48 = vpop.f32.mrb[31].mxu1  ;;  %v3459_v35 = vld [vmem:[#allocation6 + $0xb0] ss:$8 sps:$4 sm:$0xff]   ;;  %v3475_v39 = vld [vmem:[#allocation7 + $0x80] sm:$0xff]   ;;  %v3477_v41 = vld [vmem:[#allocation7 + $0x88] sm:$0xff]  }
 0xd6a   :  { %2129 = vmatpush1.bf16.msra.mxu0 %v3459_v35  ;;  %3089 = vmatpush3.bf16.msra.mxu1 %v3475_v39  ;;  %v3479_v42 = vld [vmem:[#allocation7 + $0x90] sm:$0xff]   ;;  %v3482_v48 = vld [vmem:[#allocation7 + $0xe0] sm:$0xff]   ;;  %v2035_v35 = vrot.slane %v2888_v58, %v3928_v46 }
 0xd6b   :  { %v1974_v49 = vadd.f32 %v1970_v44, %v4136_v36  ;;  %1975 = vadd.xlane.f32.xlu0 %v1973_v43  ;;  %v1981_v51 = vmul.f32 %v1973_v43, %v1973_v43  ;;  %v3462_v36 = vld [vmem:[#allocation6 + $0xc0] ss:$8 sps:$4 sm:$0xff]   ;;  %2130 = vmatprep.subr.bf16.mxu0 %v3464_v61  ;;  %v3481_v44 = vld [vmem:[#allocation7 + $0x98] sm:$0xff]   ;;  %v2039_v61 = vrot.slane %v2888_v58, %v3933_v52 }
 0xd6c   :  { %3090 = vmatprep.subr.bf16.mxu1 %v3476_v40 }
 0xd6d   :  { %1977 = vadd.xlane.f32.xlu1 %v1974_v49  ;;  %v1982_v53 = vmul.f32 %v1974_v49, %v1974_v49 }
 0xd6e   :  { %2131 = vmatpush1.bf16.msra.mxu0 %v3462_v36  ;;  %3091 = vmatpush3.bf16.msra.mxu1 %v3477_v41 }
 0xd6f   :  { %1983 = vadd.xlane.f32.xlu0 %v1981_v51  ;;  %2132 = vmatprep.subr.bf16.mxu0 %v3467_v3  ;;  %v3484_v51 = vld [vmem:[#allocation7 + $0xe8] sm:$0xff]  }
 0xd70   :  { %3092 = vmatprep.subr.bf16.mxu1 %v3478_v26 }
 0xd71   :  { %1985 = vadd.xlane.f32.xlu1 %v1982_v53  ;;  %v3485_v53 = vld [vmem:[#allocation7 + $0xa8] sm:$0xff]  }
 0xd72   :  { %2133 = vmatpush1.bf16.msra.mxu0 %v3465_v5  ;;  %3093 = vmatpush3.bf16.msra.mxu1 %v3479_v42 }
 0xd73   :  { %2134 = vmatprep.subr.bf16.mxu0 %v3470_v6 }
 0xd76   :  { %2135 = vmatpush1.bf16.msra.mxu0 %v3468_v7 }
 0xd77   :  { %2136 = vmatprep.subr.bf16.mxu0 %v3473_v8 }
 0xd7a   :  { %2137 = vmatpush1.bf16.msra.mxu0 %v3471_v9 }
 0xd7b   :  { %3257 = vmatprep.subr.bf16.mxu0 %v3696_v0 }
 0xdf8   :  { %v1976_v10 = vpop.xlane.xlu0 %1975 }
 0xdf9   :  { %v1979_v11 = vmul.f32 0.0078125, %v1976_v10 }
 0xdfa   :  { %v1978_v12 = vpop.xlane.xlu1 %1977 }
 0xdfb   :  { %v1980_v18 = vmul.f32 0.0078125, %v1978_v12  ;;  %v1989_v14 = vmul.f32 %v1979_v11, %v1979_v11  ;;  %v1993_v24 = vsub.f32 %v1973_v43, %v1979_v11  ;;  %v3480_v43 = vld [vmem:[#allocation7 + $0xd8] sm:$0xff]  }
 0xdfc   :  { %v1984_v13 = vpop.xlane.xlu0 %1983  ;;  %3094 = vmatprep.subr.bf16.mxu1 %v3480_v43 }
 0xdfd   :  { %v1987_v15 = vmul.f32 0.0078125, %v1984_v13  ;;  %v1990_v16 = vmul.f32 %v1980_v18, %v1980_v18  ;;  %v1994_v28 = vsub.f32 %v1974_v49, %v1980_v18  ;;  %3095 = vmatpush3.bf16.msra.mxu1 %v3481_v44  ;;  %v3483_v49 = vld [vmem:[#allocation7 + $0xa0] sm:$0xff]  }
 0xdfe   :  { %v1986_v22 = vpop.xlane.xlu1 %1985  ;;  %3096 = vmatprep.subr.bf16.mxu1 %v3482_v48 }
 0xdff   :  { %v1991_v17 = vsub.f32 %v1987_v15, %v1989_v14  ;;  %v1988_v19 = vmul.f32 0.0078125, %v1986_v22 }
 0xe01   :  { %v1995_v20 = vadd.f32 1e-05, %v1991_v17  ;;  %v1992_v59 = vsub.f32 %v1988_v19, %v1990_v16  ;;  %3097 = vmatpush3.bf16.msra.mxu1 %v3483_v49 }
 0xe02   :  { %3098 = vmatprep.subr.bf16.mxu1 %v3484_v51 }
 0xe03   :  { %3550 = vrsqrt.f32 %v1995_v20  ;;  %v1996_v60 = vadd.f32 1e-05, %v1992_v59 }
 0xe05   :  { %3552 = vrsqrt.f32 %v1996_v60  ;;  %3099 = vmatpush3.bf16.msra.mxu1 %v3485_v53 }
 0xe06   :  { %3100 = vmatprep.subr.bf16.mxu1 %v3486_v54 }
 0xe09   :  { %3101 = vmatpush3.bf16.msra.mxu1 %v3487_v55  ;;  %v2239_v55 = vrot.slane %v4146_v63, %v4035_v23 }
 0xe0a   :  { %3102 = vmatprep.subr.bf16.mxu1 %v3488_v56 }
 0xe0d   :  { %v3551_v27 = vpop.eup %3550  ;;  %3103 = vmatpush3.bf16.msra.mxu1 %v3489_v57 }
 0xe0e   :  { %v1999_v29 = vmul.f32 %v3551_v27, %v1993_v24  ;;  %3277 = vmatprep.subr.bf16.mxu1 %v3696_v0 }
 0xe0f   :  { %v3553_v30 = vpop.eup %3552 }
 0xe10   :  { %v2000_v31 = vmul.f32 %v3553_v30, %v1994_v28  ;;  %v2005_v32 = vmul.f32 %v2004_v25, %v1999_v29 }
 0xe12   :  { %v2006_v34 = vmul.f32 %v2004_v25, %v2000_v31  ;;  %v4190_v1 = vadd.f32 %v2010_v33, %v2005_v32 }
 0xe14   :  { %v4192_v2 = vadd.f32 %v2010_v33, %v2006_v34 }
 0xe16   :  { %v2013_v37 = vpack.c.bf16 %v4192_v2, %v4190_v1 }
 0xe18   :  { %2155 = vmatmul.mubr.bf16.vlgmr.msra.gmra.mrb[20].mxu0 %v2013_v37 }
 0xe19   :  { %3273 = vmatprep.mubr.msk.bf16.mxu0 %vm3698_vm0, %v3696_v0 }
 0xeeb   :  { %v2156_v36 = vpop.f32.mrb[20].mxu0 }
 0xeec   :  { %v2157_v3 = vadd.f32 %v2156_v36, %v2035_v35  ;;  %v2158_v5 = vpop.f32.mrb[21].mxu0 }
 0xeed   :  { %v2159_v6 = vadd.f32 %v2158_v5, %v2039_v61  ;;  %v2160_v7 = vpop.f32.mrb[22].mxu0 }
 0xeee   :  { %v2165_v8 = vmul.f32 %v2157_v3, %v2157_v3  ;;  %v2161_v9 = vadd.f32 %v2160_v7, %v2035_v35  ;;  %v2162_v10 = vpop.f32.mrb[23].mxu0 }
 0xeef   :  { %v2166_v11 = vmul.f32 %v2159_v6, %v2159_v6  ;;  %v2163_v12 = vadd.f32 %v2162_v10, %v2039_v61  ;;  %v3491_v10 = vld [vmem:[#allocation9 + $0x8] sm:$0xff]  }
 0xef0   :  { %v2169_v18 = vmul.f32 %v2165_v8, %v2157_v3  ;;  %v2167_v13 = vmul.f32 %v2161_v9, %v2161_v9 }
 0xef1   :  { %v2170_v14 = vmul.f32 %v2166_v11, %v2159_v6  ;;  %v2168_v15 = vmul.f32 %v2163_v12, %v2163_v12  ;;  %v3492_v11 = vld [vmem:[#allocation9 + $0x10] sm:$0xff]  }
 0xef2   :  { %v2173_v22 = vmul.f32 0.044715, %v2169_v18  ;;  %v2171_v16 = vmul.f32 %v2167_v13, %v2161_v9  ;;  %v3496_v18 = vld [vmem:[#allocation9 + $0x30] sm:$0xff]   ;;  %v3497_v13 = vld [vmem:[#allocation9 + $0x38] sm:$0xff]  }
 0xef3   :  { %v2174_v17 = vmul.f32 0.044715, %v2170_v14  ;;  %v2172_v46 = vmul.f32 %v2168_v15, %v2163_v12 }
 0xef4   :  { %v2177_v19 = vadd.f32 %v2173_v22, %v2157_v3  ;;  %v2175_v52 = vmul.f32 0.044715, %v2171_v16 }
 0xef5   :  { %v2178_v20 = vadd.f32 %v2174_v17, %v2159_v6  ;;  %v2176_v59 = vmul.f32 0.044715, %v2172_v46 }
 0xef6   :  { %v2181_v60 = vmul.f32 0.7978846, %v2177_v19  ;;  %v2179_v24 = vadd.f32 %v2175_v52, %v2161_v9 }
 0xef7   :  { %v2182_v25 = vmul.f32 0.7978846, %v2178_v20  ;;  %v2180_v27 = vadd.f32 %v2176_v59, %v2163_v12 }
 0xef8   :  { %3554 = vtanh.f32 %v2181_v60  ;;  %v2183_v28 = vmul.f32 0.7978846, %v2179_v24 }
 0xef9   :  { %3556 = vtanh.f32 %v2182_v25  ;;  %v2184_v29 = vmul.f32 0.7978846, %v2180_v27 }
 0xefa   :  { %3558 = vtanh.f32 %v2183_v28 }
 0xefb   :  { %3560 = vtanh.f32 %v2184_v29  ;;  %v2408_v29 = vrot.slane %v4146_v63, %v1275_v21 }
 0xf02   :  { %v3555_v30 = vpop.eup %3554 }
 0xf03   :  { %v3557_v31 = vpop.eup %3556  ;;  %v2189_v32 = vadd.f32 1.0, %v3555_v30 }
 0xf04   :  { %v3559_v33 = vpop.eup %3558  ;;  %v2190_v34 = vadd.f32 1.0, %v3557_v31 }
 0xf05   :  { %v3561_v37 = vpop.eup %3560  ;;  %v2193_v38 = vmul.f32 0.5, %v2189_v32  ;;  %v2191_v39 = vadd.f32 1.0, %v3559_v33 }
 0xf06   :  { %v2192_v40 = vadd.f32 1.0, %v3561_v37  ;;  %v2194_v41 = vmul.f32 0.5, %v2190_v34  ;;  %v2987_v34 = vld [vmem:[%s4262_s3 + $0x18] ss:$0 sm:$0xff] }
 0xf07   :  { %v2195_v26 = vmul.f32 0.5, %v2191_v39  ;;  %v2197_v43 = vmul.f32 %v2193_v38, %v2157_v3 }
 0xf08   :  { %v2196_v42 = vmul.f32 0.5, %v2192_v40  ;;  %v2198_v48 = vmul.f32 %v2194_v41, %v2159_v6 }
 0xf09   :  { %v2199_v44 = vmul.f32 %v2195_v26, %v2161_v9  ;;  %v3490_v9 = vld [vmem:[#allocation9] sm:$0xff]  }
 0xf0a   :  { %v2200_v49 = vmul.f32 %v2196_v42, %v2163_v12  ;;  %3258 = vmatpush3.bf16.msra.mxu0 %v3490_v9  ;;  %v3495_v12 = vld [vmem:[#allocation9 + $0x28] sm:$0xff]   ;;  %v3504_v9 = vld [vmem:[#allocation9 + $0x70] sm:$0xff]  }
 0xf0b   :  { %v2201_v51 = vpack.c.bf16 %v2199_v44, %v2197_v43  ;;  %3259 = vmatprep.subr.bf16.mxu0 %v3696_v0 }
 0xf0c   :  { %v2202_v53 = vpack.c.bf16 %v2200_v49, %v2198_v48  ;;  %v3498_v49 = vld [vmem:[#allocation9 + $0x40] sm:$0xff]  }
 0xf0e   :  { %2368 = vmatprep.mubr.bf16.mxu1 %v2202_v53  ;;  %3260 = vmatpush3.bf16.msra.mxu0 %v3491_v10  ;;  %v3505_v10 = vld [vmem:[#allocation9 + $0x78] sm:$0xff]  }
 0xf0f   :  { %2369 = vmatmul.mubr.bf16.vlgmr.msra.gmra.mrb[32].mxu1 %v2201_v51  ;;  %3261 = vmatprep.subr.bf16.mxu0 %v3696_v0  ;;  %v4227_v51 = vld [vmem:[#allocation2] sm:$0xff] }
 0xf10   :  { %3293 = vmatprep.mubr.msk.bf16.mxu1 %vm3698_vm0, %v3696_v0  ;;  %3278 = vmatpush3.bf16.msra.mxu1 %v3498_v49  ;;  %v2438_v53 = vrot.slane %v4227_v51, %v3948_v62  ;;  %v3501_v62 = vld [vmem:[#allocation9 + $0x58] sm:$0xff]  }
 0xf11   :  { %3279 = vmatprep.subr.bf16.mxu1 %v3696_v0 }
 0xf12   :  { %3262 = vmatpush3.bf16.msra.mxu0 %v3492_v11  ;;  %v3506_v11 = vld [vmem:[#allocation9 + $0x80] sm:$0xff]  }
 0xf13   :  { %3263 = vmatprep.subr.bf16.mxu0 %v3696_v0 }
 0xfe2   :  { %v3104_v54 = vpop.f32.mrb[32].mxu1 }
 0xfe3   :  { %v3105_v56 = vpop.f32.mrb[33].mxu1 }
 0xfe4   :  { %v3106_v57 = vadd.f32 %v3105_v56, %v3104_v54  ;;  %v3107_v58 = vpop.f32.mrb[34].mxu1 }
 0xfe5   :  { %v3108_v35 = vpop.f32.mrb[35].mxu1 }
 0xfe6   :  { %v2371_v61 = vadd.f32 %v3106_v57, %v2239_v55  ;;  %v3109_v36 = vadd.f32 %v3108_v35, %v3107_v58 }
 0xfe8   :  { %v2374_v3 = vadd.f32 %v3109_v36, %v2239_v55  ;;  %v2377_v5 = vadd.f32 %v2371_v61, %v4190_v1  ;;  %v3493_v1 = vld [vmem:[#allocation9 + $0x18] sm:$0xff]  }
 0xfe9   :  { %3264 = vmatpush3.bf16.msra.mxu0 %v3493_v1  ;;  %v3507_v1 = vld [vmem:[#allocation9 + $0x88] sm:$0xff]  }
 0xfea   :  { %2379 = vadd.xlane.f32.xlu1 %v2377_v5  ;;  %v2378_v6 = vadd.f32 %v2374_v3, %v4192_v2  ;;  %v2385_v7 = vmul.f32 %v2377_v5, %v2377_v5  ;;  %3265 = vmatprep.subr.bf16.mxu0 %v3696_v0  ;;  %v3494_v2 = vld [vmem:[#allocation9 + $0x20] sm:$0xff]  }
 0xfec   :  { %2381 = vadd.xlane.f32.xlu0 %v2378_v6  ;;  %v2386_v8 = vmul.f32 %v2378_v6, %v2378_v6 }
 0xfed   :  { %3266 = vmatpush3.bf16.msra.mxu0 %v3494_v2  ;;  %v3508_v2 = vld [vmem:[#allocation9 + $0x90] sm:$0xff]  }
 0xfee   :  { %2387 = vadd.xlane.f32.xlu1 %v2385_v7  ;;  %3267 = vmatprep.subr.bf16.mxu0 %v3696_v0  ;;  %v3502_v7 = vld [vmem:[#allocation9 + $0x60] sm:$0xff]  }
 0xff0   :  { %2389 = vadd.xlane.f32.xlu0 %v2386_v8  ;;  %v3503_v8 = vld [vmem:[#allocation9 + $0x68] sm:$0xff]  }
 0xff1   :  { %3268 = vmatpush3.bf16.msra.mxu0 %v3495_v12  ;;  %v3509_v12 = vld [vmem:[#allocation9 + $0x98] sm:$0xff]  }
 0xff2   :  { %3269 = vmatprep.subr.bf16.mxu0 %v3696_v0 }
 0xff5   :  { %3270 = vmatpush3.bf16.msra.mxu0 %v3496_v18  ;;  %v3510_v18 = vld [vmem:[#allocation9 + $0xa0] sm:$0xff]  }
 0xff6   :  { %3271 = vmatprep.subr.bf16.mxu0 %v3696_v0 }
 0xff9   :  { %3272 = vmatpush3.bf16.msra.mxu0 %v3497_v13  ;;  %v3511_v13 = vld [vmem:[#allocation9 + $0xa8] sm:$0xff]  }
 0xffa   :  { %3297 = vmatprep.subr.bf16.mxu0 %v3696_v0 }
0x1077   :  { %v2380_v14 = vpop.xlane.xlu1 %2379 }
0x1078   :  { %v2383_v15 = vmul.f32 0.0078125, %v2380_v14  ;;  %v3512_v14 = vld [vmem:[#allocation9 + $0xb0] sm:$0xff]  }
0x1079   :  { %v2382_v22 = vpop.xlane.xlu0 %2381 }
0x107a   :  { %v2384_v16 = vmul.f32 0.0078125, %v2382_v22  ;;  %v2393_v46 = vmul.f32 %v2383_v15, %v2383_v15  ;;  %v2397_v28 = vsub.f32 %v2377_v5, %v2383_v15  ;;  %v3499_v5 = vld [vmem:[#allocation9 + $0x48] sm:$0xff]  }
0x107b   :  { %v2388_v17 = vpop.xlane.xlu1 %2387  ;;  %3280 = vmatpush3.bf16.msra.mxu1 %v3499_v5 }
0x107c   :  { %v2391_v19 = vmul.f32 0.0078125, %v2388_v17  ;;  %v2394_v20 = vmul.f32 %v2384_v16, %v2384_v16  ;;  %v2398_v31 = vsub.f32 %v2378_v6, %v2384_v16  ;;  %3281 = vmatprep.subr.bf16.mxu1 %v3696_v0  ;;  %v3500_v6 = vld [vmem:[#allocation9 + $0x50] sm:$0xff]  }
0x107d   :  { %v2390_v52 = vpop.xlane.xlu0 %2389 }
0x107e   :  { %v2395_v59 = vsub.f32 %v2391_v19, %v2393_v46  ;;  %v2392_v60 = vmul.f32 0.0078125, %v2390_v52 }
0x107f   :  { %3282 = vmatpush3.bf16.msra.mxu1 %v3500_v6 }
0x1080   :  { %v2399_v24 = vadd.f32 1e-05, %v2395_v59  ;;  %v2396_v25 = vsub.f32 %v2392_v60, %v2394_v20  ;;  %3283 = vmatprep.subr.bf16.mxu1 %v3696_v0  ;;  %v2556_v20 = vrot.slane %v4227_v51, %v3997_v4 }
0x1082   :  { %3562 = vrsqrt.f32 %v2399_v24  ;;  %v2400_v27 = vadd.f32 1e-05, %v2396_v25  ;;  %v2561_v25 = vrot.slane %v4227_v51, %v4004_v47  ;;  %v2694_v47 = vrot.slane %v4227_v51, %v4035_v23 }
0x1083   :  { %3284 = vmatpush3.bf16.msra.mxu1 %v3501_v62 }
0x1084   :  { %3564 = vrsqrt.f32 %v2400_v27  ;;  %3285 = vmatprep.subr.bf16.mxu1 %v3696_v0 }
0x1087   :  { %3286 = vmatpush3.bf16.msra.mxu1 %v3502_v7 }
0x1088   :  { %3287 = vmatprep.subr.bf16.mxu1 %v3696_v0 }
0x108b   :  { %3288 = vmatpush3.bf16.msra.mxu1 %v3503_v8 }
0x108c   :  { %v3563_v30 = vpop.eup %3562  ;;  %3289 = vmatprep.subr.bf16.mxu1 %v3696_v0 }
0x108d   :  { %v2403_v32 = vmul.f32 %v3563_v30, %v2397_v28  ;;  %v2584_v30 = vrot.slane %v4227_v51, %v4009_v50 }
0x108e   :  { %v3565_v33 = vpop.eup %3564 }
0x108f   :  { %v2404_v37 = vmul.f32 %v3565_v33, %v2398_v31  ;;  %v2409_v38 = vmul.f32 %v2408_v29, %v2403_v32  ;;  %3290 = vmatpush3.bf16.msra.mxu1 %v3504_v9 }
0x1090   :  { %3291 = vmatprep.subr.bf16.mxu1 %v3696_v0 }
0x1091   :  { %v2410_v39 = vmul.f32 %v2408_v29, %v2404_v37  ;;  %v2415_v40 = vadd.f32 %v2987_v34, %v2409_v38  ;;  %v3513_v29 = vld [vmem:[#allocation9 + $0xb8] sm:$0xff]   ;;  %v3699_v38 = vmov 1966171168  }
0x1093   :  { %v2416_v41 = vadd.f32 %v2987_v34, %v2410_v39  ;;  %v2417_v26 = vpack.c.bf16 %v2415_v40, %v2415_v40  ;;  %3292 = vmatpush3.bf16.msra.mxu1 %v3505_v10  ;;  %v2785_v39 = vunpack.c.l.s4 %v3699_v38 }
0x1095   :  { %v2418_v42 = vpack.c.bf16 %v2416_v41, %v2416_v41  ;;  %v2441_v44 = vunpack.c.l.b16 %v2417_v26  ;;  %v2786_v40 = vunpack.c.0.s8 %v2785_v39 }
0x1097   :  { %v2442_v43 = vunpack.c.l.b16 %v2418_v42  ;;  %v2789_v41 = vsub.s32 %v2786_v40, %v3925_v45 }
0x1099   :  { %v2443_v48 = vrot.slane %v2442_v43, 7 }
0x109b   :  { %v2445_v21 = vsel %vm2444_vm2, %v2443_v48, %v2441_v44 }
0x109c   :  { %v2446_v63 = vpack.c.b16 %v2445_v21, %v2445_v21 }
0x109e   :  { %3274 = vmatmul.mubr.bf16.vlgmr.msra.gmra.mrb[24].mxu0 %v2446_v63 }
0x109f   :  { %3313 = vmatprep.mubr.msk.bf16.mxu0 %vm3698_vm0, %v3696_v0  ;;  %3298 = vmatpush3.bf16.msra.mxu0 %v3506_v11 }
0x10a0   :  { %3299 = vmatprep.subr.bf16.mxu0 %v3696_v0 }
0x10a3   :  { %3300 = vmatpush3.bf16.msra.mxu0 %v3507_v1 }
0x10a4   :  { %3301 = vmatprep.subr.bf16.mxu0 %v3696_v0 }
0x10a7   :  { %3302 = vmatpush3.bf16.msra.mxu0 %v3508_v2 }
0x10a8   :  { %3303 = vmatprep.subr.bf16.mxu0 %v3696_v0 }
0x10ab   :  { %3304 = vmatpush3.bf16.msra.mxu0 %v3509_v12 }
0x10ac   :  { %3305 = vmatprep.subr.bf16.mxu0 %v3696_v0 }
0x10af   :  { %3306 = vmatpush3.bf16.msra.mxu0 %v3510_v18 }
0x10b0   :  { %3307 = vmatprep.subr.bf16.mxu0 %v3696_v0 }
0x10b3   :  { %3308 = vmatpush3.bf16.msra.mxu0 %v3511_v13 }
0x10b4   :  { %3309 = vmatprep.subr.bf16.mxu0 %v3696_v0 }
0x10b7   :  { %3310 = vmatpush3.bf16.msra.mxu0 %v3512_v14 }
0x10b8   :  { %3311 = vmatprep.subr.bf16.mxu0 %v3696_v0 }
0x10bb   :  { %3312 = vmatpush3.bf16.msra.mxu0 %v3513_v29 }
0x1171   :  { %v2530_v54 = vpop.f32.mrb[24].mxu0 }
0x1172   :  { %v2531_v55 = vadd.f32 %v2530_v54, %v2438_v53  ;;  %v3275_v56 = vpop.f32.mrb[25].mxu0 }
0x1173   :  { %v2533_v57 = vpop.f32.mrb[26].mxu0 }
0x1174   :  { %3566 = vtanh.f32 %v2531_v55  ;;  %v3276_v58 = vpop.f32.mrb[27].mxu0 }
0x117e   :  { %v3567_v35 = vpop.eup %3566 }
0x117f   :  { %v2538_v61 = vsel %vm2537_vm3, %v3567_v35, 0.0  ;;  %v2542_v36 = vmul.f32 %v3567_v35, %v3567_v35 }
0x1180   :  { %2539 = vadd.xlane.f32.xlu0 %v2538_v61 }
0x1181   :  { %v2543_v3 = vsel %vm2537_vm3, %v2542_v36, 0.0 }
0x1182   :  { %2544 = vadd.xlane.f32.xlu1 %v2543_v3 }
0x120d   :  { %v2540_v15 = vpop.xlane.xlu0 %2539 }
0x120e   :  { %v2541_v22 = vmul.f32 0.0078125, %v2540_v15 }
0x120f   :  { %v2545_v16 = vpop.xlane.xlu1 %2544 }
0x1210   :  { %v2547_v17 = vmul.f32 %v2541_v22, %v2541_v22  ;;  %v2546_v46 = vmul.f32 0.0078125, %v2545_v16  ;;  %v2549_v59 = vsub.f32 %v3567_v35, %v2541_v22 }
0x1212   :  { %v2548_v19 = vsub.f32 %v2546_v46, %v2547_v17 }
0x1214   :  { %v2550_v52 = vadd.f32 1e-05, %v2548_v19 }
0x1216   :  { %3568 = vrsqrt.f32 %v2550_v52 }
0x1220   :  { %v3569_v60 = vpop.eup %3568 }
0x1221   :  { %v2552_v24 = vmul.f32 %v3569_v60, %v2549_v59 }
0x1223   :  { %v2557_v27 = vmul.f32 %v2556_v20, %v2552_v24 }
0x1225   :  { %v2562_v28 = vadd.f32 %v2561_v25, %v2557_v27 }
0x1227   :  { %v2563_v0 = vpack.c.bf16 %v2562_v28, %v2562_v28 }
0x1229   :  { %3294 = vmatmul.mubr.bf16.vlgmr.msra.gmra.mrb[36].mxu1 %v2563_v0 }
0x12fc   :  { %v2667_v31 = vpop.f32.mrb[36].mxu1 }
0x12fd   :  { %v2668_v32 = vadd.f32 %v2667_v31, %v2584_v30  ;;  %v3295_v33 = vpop.f32.mrb[37].mxu1 }
0x12fe   :  { %v2670_v34 = vpop.f32.mrb[38].mxu1 }
0x12ff   :  { %v2673_v4 = vpack.c.bf16 %v2668_v32, %v2668_v32  ;;  %v3296_v37 = vpop.f32.mrb[39].mxu1 }
0x1301   :  { %3314 = vmatmul.mubr.bf16.vlgmr.msra.gmra.mrb[28].mxu0 %v2673_v4 }
0x13d4   :  { %v2777_v26 = vpop.f32.mrb[28].mxu0 }
0x13d5   :  { %v2778_v42 = vadd.f32 %v2777_v26, %v2694_v47  ;;  %v3315_v43 = vpop.f32.mrb[29].mxu0 }
0x13d6   :  { %v2780_v44 = vpop.f32.mrb[30].mxu0 }
0x13d7   :  { %v2790_v50 = vrot.slane %v2778_v42, %v2789_v41  ;;  %v3316_v48 = vpop.f32.mrb[31].mxu0 }
0x13d9   :  { %v2791_v21 = vcombine.high %v2790_v50, %v2790_v50  ;;  %3012 = vst.sshfl [vmem:[%s4269_s10] sm:$0x1 pattern:$0x73625140] %v2790_v50 }
0x13db   :  { %3013 = vst.sshfl [vmem:[%s4269_s10 + $0x1] sm:$0x1 pattern:$0x73625140] %v2791_v21 }
0x13dc   :  { %2814 = vsyncpa [#allocation3], 1 }
0x13dd   :  { %2815 = vsyncpa [#allocation5], 1 }
0x13de   :  { %2816 = vsyncpa [#allocation8], 1 }

</bundles_post_ra>
